<compile_context>
chip_gen: v7x
topology: tpu7x:2x2x1
jax: 0.10.0
libtpu: 0.0.40
codegen_flags: <defaults>
</compile_context>

<pallas_src>
import functools
import math

import jax
import jax.numpy as jnp
import numpy as np
from jax.experimental import pallas as pl
from jax.experimental.pallas import tpu as pltpu


def _gtc_kernel(idx_ref, pred_ref, invc_ref,
                ow1s_ref, ow1o_ref, w1p_ref, b1_ref,
                w2so_ref, b2so_ref, w2p_ref, b2p_ref,
                w3a_ref, b3a_ref, w3b_ref, b3b_ref,
                new_obj_ref, new_p_ref,
                pooled_acc, *, num_objs, hidden_dim):
    """One tile of edges per grid step (P3 accumulator over the edge axis).

    idx_ref     : (TT, 2) int32   subject/object indices (-1 = padding edge)
    pred_ref    : (TT, Din)       predicate vectors for this tile
    invc_ref    : (O, 1) f32      1/clamp(counts,1)  (ones for 'sum' pooling)
    ow1s/ow1o   : (O, H)          obj_vecs @ W1_s / W1_o  (gather folded)
    w1p, b1     : (Din, H), (1,H) net1 layer 0 predicate block + bias
    w2so, b2so  : (H, 2H), (1,2H) net1 layer 1 merged [s|o] output blocks
    w2p, b2p    : (H, Dp), (1,Dp) net1 layer 1 predicate block, lane-padded
    w3a..b3b    : net2 layers (b3/W3b lane-padded to Dp)
    new_obj_ref : (O, Dp)         object output, written on the last step
    new_p_ref   : (TT, Dp)        per-edge predicate output (lane-dense)
    pooled_acc  : (O, H) VMEM f32 scatter-add accumulator
    """
    t = pl.program_id(0)
    cdt = ow1s_ref.dtype                      # MXU compute dtype (bf16 or f32)

    @pl.when(t == 0)
    def _():
        pooled_acc[...] = jnp.zeros_like(pooled_acc)

    idx = idx_ref[...]                                            # (TT, 2)
    s_idx = idx[:, 0:1]                                           # (TT, 1)
    o_idx = idx[:, 1:2]
    tt = idx.shape[0]
    obj_ids = jax.lax.broadcasted_iota(jnp.int32, (tt, num_objs), 1)
    s_oh = (s_idx == obj_ids).astype(cdt)                         # (TT, O) exact
    o_oh = (o_idx == obj_ids).astype(cdt)

    # net1 layer 0 on the (virtual) concat [s, p, o]; the s/o gathers are
    # folded into the precomputed obj_vecs @ W1{s,o} blocks.
    h1 = (jnp.dot(s_oh, ow1s_ref[...], preferred_element_type=jnp.float32)
          + jnp.dot(o_oh, ow1o_ref[...], preferred_element_type=jnp.float32)
          + jnp.dot(pred_ref[...], w1p_ref[...],
                    preferred_element_type=jnp.float32)
          + b1_ref[...])
    h1 = jnp.maximum(h1, 0.0).astype(cdt)                         # (TT, H)

    # net1 layer 1: merged [W2_s | W2_o] fills the MXU N dim; W2_p is kept
    # separate and lane-padded so the new_p store is lane-dense.
    so = jnp.maximum(
        jnp.dot(h1, w2so_ref[...], preferred_element_type=jnp.float32)
        + b2so_ref[...], 0.0)                                     # (TT, 2H)
    new_p = jnp.maximum(
        jnp.dot(h1, w2p_ref[...], preferred_element_type=jnp.float32)
        + b2p_ref[...], 0.0)                                      # (TT, Dp)
    new_p_ref[...] = new_p.astype(new_p_ref.dtype)

    # Fused scatter_add: one dot_general with K = 2*TT; the edge axis of both
    # operands is contracted directly (no explicit transpose).
    # TODO(synk): verify via pl.lower_as_mlir that this contraction does not
    # lower to an XLU transpose + standard matmul on the target generation.
    so_c = so.astype(cdt)
    new_so = jnp.concatenate([so_c[:, :hidden_dim], so_c[:, hidden_dim:]],
                             axis=0)                              # (2TT, H)
    so_oh = jnp.concatenate([s_oh, o_oh], axis=0)                 # (2TT, O)
    dn = (((0,), (0,)), ((), ()))
    pooled_acc[...] += jax.lax.dot_general(
        so_oh, new_so, dn, preferred_element_type=jnp.float32)    # (O, H)

    @pl.when(t == pl.num_programs(0) - 1)
    def _():
        pooled = (pooled_acc[...] * invc_ref[...]).astype(cdt)    # avg / sum
        h2 = jnp.maximum(
            jnp.dot(pooled, w3a_ref[...], preferred_element_type=jnp.float32)
            + b3a_ref[...], 0.0).astype(cdt)                      # (O, H)
        out = jnp.maximum(
            jnp.dot(h2, w3b_ref[...], preferred_element_type=jnp.float32)
            + b3b_ref[...], 0.0)                                  # (O, Dp)
        new_obj_ref[...] = out.astype(new_obj_ref.dtype)


def _default_edge_tile():
    """Per-generation edge tile: 256 for the 256-wide MXU (v6e/v7x), else 128."""
    try:
        kind = jax.devices()[0].device_kind.lower()
        if "v6" in kind or "v7" in kind:
            return 256
    except Exception:
        pass
    return 128


def graph_triple_conv_forward(obj_vecs, pred_vecs, edges, params,
                              pooling="avg", edge_tile=None, use_bf16=True):
    """Pallas equivalent of GraphTripleConv.forward.

    obj_vecs : (O, Din) f32, pred_vecs : (T, Din) f32, edges : (T, 2) int32.
    Returns (new_obj_vecs (O, Dout), new_pred_vecs (T, Dout)).
    """
    assert pooling in ("sum", "avg")
    O, Din = obj_vecs.shape
    T = pred_vecs.shape[0]
    H = params["net2_w0"].shape[0]
    Dout = params["net2_w1"].shape[0]
    cdt = jnp.bfloat16 if use_bf16 else jnp.float32
    hp = jax.lax.Precision.HIGHEST

    # Per-object inverse edge counts (done once in plain XLA; removes the
    # N=1 count matmul and the count accumulator from the kernel).
    if pooling == "avg" and T > 0:
        counts = (jnp.zeros((O,), jnp.float32)
                  .at[edges[:, 0]].add(1.0)
                  .at[edges[:, 1]].add(1.0))
        inv_count = (1.0 / jnp.maximum(counts, 1.0)).reshape(O, 1)
    else:
        inv_count = jnp.ones((O, 1), jnp.float32)

    # --- weight preparation (PyTorch Linear stores W as (out, in)) ----------
    w1t = params["net1_w0"].T                                     # (3Din, H)
    w1s_f, w1p_f, w1o_f = w1t[:Din], w1t[Din:2 * Din], w1t[2 * Din:]
    obj_w1s = jnp.dot(obj_vecs, w1s_f, precision=hp).astype(cdt)  # gather fold
    obj_w1o = jnp.dot(obj_vecs, w1o_f, precision=hp).astype(cdt)
    w1p = w1p_f.astype(cdt)
    b1 = params["net1_b0"].reshape(1, H).astype(jnp.float32)

    Dp = ((Dout + 127) // 128) * 128          # lane-dense padded output width
    w2t = params["net1_w1"].T                                     # (H, 2H+Dout)
    b2 = params["net1_b1"]
    w2so = jnp.concatenate([w2t[:, :H], w2t[:, H + Dout:]], axis=1).astype(cdt)
    b2so = jnp.concatenate([b2[:H], b2[H + Dout:]]).reshape(1, 2 * H)
    b2so = b2so.astype(jnp.float32)
    w2p = jnp.pad(w2t[:, H:H + Dout], ((0, 0), (0, Dp - Dout))).astype(cdt)
    b2p = jnp.pad(b2[H:H + Dout], (0, Dp - Dout)).reshape(1, Dp)
    b2p = b2p.astype(jnp.float32)

    w3a = params["net2_w0"].T.astype(cdt)                         # (H, H)
    b3a = params["net2_b0"].reshape(1, H).astype(jnp.float32)
    w3b = jnp.pad(params["net2_w1"].T, ((0, 0), (0, Dp - Dout))).astype(cdt)
    b3b = jnp.pad(params["net2_b1"], (0, Dp - Dout)).reshape(1, Dp)
    b3b = b3b.astype(jnp.float32)

    if T == 0:
        # No edges: pooled features are all zero; run net2 in plain XLA.
        pooled = jnp.zeros((O, H), jnp.float32)
        h2 = jax.nn.relu(jnp.dot(pooled, params["net2_w0"].T, precision=hp)
                         + params["net2_b0"])
        new_obj = jax.nn.relu(jnp.dot(h2, params["net2_w1"].T, precision=hp)
                              + params["net2_b1"])
        return (new_obj.astype(obj_vecs.dtype),
                jnp.zeros((0, Dout), pred_vecs.dtype))

    if edge_tile is None:
        edge_tile = _default_edge_tile()
    n_tiles = pl.cdiv(T, edge_tile)
    T_pad = n_tiles * edge_tile
    pad = T_pad - T
    idx_pad = jnp.pad(edges.astype(jnp.int32), ((0, pad), (0, 0)),
                      constant_values=-1)          # -1 → all-zero one-hot rows
    pred_pad = jnp.pad(pred_vecs, ((0, pad), (0, 0))).astype(cdt)

    kernel = functools.partial(_gtc_kernel, num_objs=O, hidden_dim=H)
    full = lambda t: (0, 0)     # grid-invariant operands: DMA'd once
    tiled = lambda t: (t, 0)    # per-edge-tile operands

    new_obj_pad, new_p_pad = pl.pallas_call(
        kernel,
        out_shape=(jax.ShapeDtypeStruct((O, Dp), obj_vecs.dtype),
                   jax.ShapeDtypeStruct((T_pad, Dp), pred_vecs.dtype)),
        grid_spec=pltpu.PrefetchScalarGridSpec(
            num_scalar_prefetch=0,
            grid=(n_tiles,),
            in_specs=[
                pl.BlockSpec((edge_tile, 2), tiled),       # edge indices
                pl.BlockSpec((edge_tile, Din), tiled),     # pred_vecs tile
                pl.BlockSpec((O, 1), full),                # 1/clamp(counts,1)
                pl.BlockSpec((O, H), full),                # obj_vecs @ W1_s
                pl.BlockSpec((O, H), full),                # obj_vecs @ W1_o
                pl.BlockSpec((Din, H), full),              # W1_p
                pl.BlockSpec((1, H), full),                # b1
                pl.BlockSpec((H, 2 * H), full),            # [W2_s | W2_o]
                pl.BlockSpec((1, 2 * H), full),            # [b2_s | b2_o]
                pl.BlockSpec((H, Dp), full),               # W2_p (lane-padded)
                pl.BlockSpec((1, Dp), full),               # b2_p
                pl.BlockSpec((H, H), full),                # net2 W0
                pl.BlockSpec((1, H), full),                # net2 b0
                pl.BlockSpec((H, Dp), full),               # net2 W1 (padded)
                pl.BlockSpec((1, Dp), full),               # net2 b1
            ],
            out_specs=[
                pl.BlockSpec((O, Dp), full),               # new_obj_vecs
                pl.BlockSpec((edge_tile, Dp), tiled),      # new_pred_vecs
            ],
            scratch_shapes=[
                pltpu.VMEM((O, H), jnp.float32),           # pooled accumulator
            ]),
        compiler_params=pltpu.CompilerParams(
            dimension_semantics=("arbitrary",)),           # reduction over edges
    )(idx_pad, pred_pad, inv_count,
      obj_w1s, obj_w1o, w1p, b1,
      w2so, b2so, w2p, b2p,
      w3a, b3a, w3b, b3b)

    return new_obj_pad[:, :Dout], new_p_pad[:T, :Dout]


# ----------------------------------------------------------------------------
# Pure-JAX reference mirroring the PyTorch forward (dropout / batchnorm off).
# ----------------------------------------------------------------------------
def _linear(x, w, b):
    return jnp.dot(x, w.T, precision=jax.lax.Precision.HIGHEST) + b


def graph_triple_conv_reference(obj_vecs, pred_vecs, edges, params,
                                pooling="avg"):
    O = obj_vecs.shape[0]
    H = params["net2_w0"].shape[0]
    Dout = params["net2_w1"].shape[0]

    s_idx = edges[:, 0]
    o_idx = edges[:, 1]
    cur_s = obj_vecs[s_idx]
    cur_o = obj_vecs[o_idx]
    cur_t = jnp.concatenate([cur_s, pred_vecs, cur_o], axis=1)

    h1 = jax.nn.relu(_linear(cur_t, params["net1_w0"], params["net1_b0"]))
    t2 = jax.nn.relu(_linear(h1, params["net1_w1"], params["net1_b1"]))
    new_s = t2[:, :H]
    new_p = t2[:, H:H + Dout]
    new_o = t2[:, H + Dout:]

    pooled = jnp.zeros((O, H), obj_vecs.dtype)
    pooled = pooled.at[s_idx].add(new_s)
    pooled = pooled.at[o_idx].add(new_o)
    if pooling == "avg":
        counts = jnp.zeros((O,), obj_vecs.dtype)
        counts = counts.at[s_idx].add(1.0).at[o_idx].add(1.0)
        pooled = pooled / jnp.maximum(counts, 1.0)[:, None]

    h2 = jax.nn.relu(_linear(pooled, params["net2_w0"], params["net2_b0"]))
    new_obj = jax.nn.relu(_linear(h2, params["net2_w1"], params["net2_b1"]))
    return new_obj, new_p


def init_params(key, input_dim, hidden_dim, output_dim):
    """Deterministic synthetic init matching the module's parameter shapes
    (Kaiming-normal weights like init_parameters(), small random biases)."""
    def kaiming(k, shape):
        return jax.random.normal(k, shape, jnp.float32) * math.sqrt(2.0 / shape[1])

    ks = jax.random.split(key, 8)
    return {
        "net1_w0": kaiming(ks[0], (hidden_dim, 3 * input_dim)),
        "net1_b0": jax.random.normal(ks[1], (hidden_dim,), jnp.float32) * 0.01,
        "net1_w1": kaiming(ks[2], (2 * hidden_dim + output_dim, hidden_dim)),
        "net1_b1": jax.random.normal(ks[3], (2 * hidden_dim + output_dim,),
                                     jnp.float32) * 0.01,
        "net2_w0": kaiming(ks[4], (hidden_dim, hidden_dim)),
        "net2_b0": jax.random.normal(ks[5], (hidden_dim,), jnp.float32) * 0.01,
        "net2_w1": kaiming(ks[6], (output_dim, hidden_dim)),
        "net2_b1": jax.random.normal(ks[7], (output_dim,), jnp.float32) * 0.01,
    }


if __name__ == "__main__":
    # Small scene graph: O=40 objects, T=300 triples, Din=64, hidden=128, Dout=64.
    # T > edge_tile so the multi-step accumulator path is exercised.
    O, T = 40, 300
    Din, H, Dout = 64, 128, 64

    key = jax.random.PRNGKey(0)
    k_obj, k_pred, k_edge, k_par = jax.random.split(key, 4)
    obj_vecs = jax.random.normal(k_obj, (O, Din), jnp.float32)
    pred_vecs = jax.random.normal(k_pred, (T, Din), jnp.float32)
    edges = jax.random.randint(k_edge, (T, 2), 0, O, dtype=jnp.int32)
    params = init_params(k_par, Din, H, Dout)

    ref_obj, ref_p = graph_triple_conv_reference(obj_vecs, pred_vecs, edges,
                                                 params, pooling="avg")

    # f32 MXU-input path: tight structural check.
    obj32, p32 = graph_triple_conv_forward(obj_vecs, pred_vecs, edges, params,
                                           pooling="avg", edge_tile=128,
                                           use_bf16=False)
    obj32, p32 = jax.block_until_ready((obj32, p32))
    np.testing.assert_allclose(np.asarray(obj32), np.asarray(ref_obj),
                               rtol=1e-2, atol=1e-2)
    np.testing.assert_allclose(np.asarray(p32), np.asarray(ref_p),
                               rtol=1e-2, atol=1e-2)

    # bf16 MXU-input path (f32 accumulation), per-generation default edge tile.
    obj16, p16 = graph_triple_conv_forward(obj_vecs, pred_vecs, edges, params,
                                           pooling="avg", use_bf16=True)
    obj16, p16 = jax.block_until_ready((obj16, p16))
    np.testing.assert_allclose(np.asarray(obj16), np.asarray(ref_obj),
                               rtol=3e-2, atol=3e-2)
    np.testing.assert_allclose(np.asarray(p16), np.asarray(ref_p),
                               rtol=3e-2, atol=3e-2)

    print("KERNEL_OK")
</pallas_src>

<mosaic_0001>
module attributes {stable_mosaic.version = 11 : i64} {
  func.func @_gtc_kernel(%arg0: i32, %arg1: memref<128x2xi32, #tpu.memory_space<vmem>>, %arg2: memref<128x64xf32, #tpu.memory_space<vmem>>, %arg3: memref<40x1xf32, #tpu.memory_space<vmem>>, %arg4: memref<40x128xf32, #tpu.memory_space<vmem>>, %arg5: memref<40x128xf32, #tpu.memory_space<vmem>>, %arg6: memref<64x128xf32, #tpu.memory_space<vmem>>, %arg7: memref<1x128xf32, #tpu.memory_space<vmem>>, %arg8: memref<128x256xf32, #tpu.memory_space<vmem>>, %arg9: memref<1x256xf32, #tpu.memory_space<vmem>>, %arg10: memref<128x128xf32, #tpu.memory_space<vmem>>, %arg11: memref<1x128xf32, #tpu.memory_space<vmem>>, %arg12: memref<128x128xf32, #tpu.memory_space<vmem>>, %arg13: memref<1x128xf32, #tpu.memory_space<vmem>>, %arg14: memref<128x128xf32, #tpu.memory_space<vmem>>, %arg15: memref<1x128xf32, #tpu.memory_space<vmem>>, %arg16: memref<40x128xf32, #tpu.memory_space<vmem>>, %arg17: memref<128x128xf32, #tpu.memory_space<vmem>>, %arg18: memref<40x128xf32, #tpu.memory_space<vmem>>) attributes {dimension_semantics = [#tpu.dimension_semantics<arbitrary>], iteration_bounds = array<i64: 3>, scalar_prefetch = 0 : i64, scratch_operands = 1 : i64, tpu.core_type = #tpu.core_type<tc>, window_params = [{transform_indices = @transform_0, window_bounds = array<i64: 128, 2>}, {transform_indices = @transform_1, window_bounds = array<i64: 128, 64>}, {pipeline_mode = #tpu.pipeline_mode<synchronous>, transform_indices = @transform_2, window_bounds = array<i64: 40, 1>}, {pipeline_mode = #tpu.pipeline_mode<synchronous>, transform_indices = @transform_3, window_bounds = array<i64: 40, 128>}, {pipeline_mode = #tpu.pipeline_mode<synchronous>, transform_indices = @transform_4, window_bounds = array<i64: 40, 128>}, {pipeline_mode = #tpu.pipeline_mode<synchronous>, transform_indices = @transform_5, window_bounds = array<i64: 64, 128>}, {pipeline_mode = #tpu.pipeline_mode<synchronous>, transform_indices = @transform_6, window_bounds = array<i64: 1, 128>}, {pipeline_mode = #tpu.pipeline_mode<synchronous>, transform_indices = @transform_7, window_bounds = array<i64: 128, 256>}, {pipeline_mode = #tpu.pipeline_mode<synchronous>, transform_indices = @transform_8, window_bounds = array<i64: 1, 256>}, {pipeline_mode = #tpu.pipeline_mode<synchronous>, transform_indices = @transform_9, window_bounds = array<i64: 128, 128>}, {pipeline_mode = #tpu.pipeline_mode<synchronous>, transform_indices = @transform_10, window_bounds = array<i64: 1, 128>}, {pipeline_mode = #tpu.pipeline_mode<synchronous>, transform_indices = @transform_11, window_bounds = array<i64: 128, 128>}, {pipeline_mode = #tpu.pipeline_mode<synchronous>, transform_indices = @transform_12, window_bounds = array<i64: 1, 128>}, {pipeline_mode = #tpu.pipeline_mode<synchronous>, transform_indices = @transform_13, window_bounds = array<i64: 128, 128>}, {pipeline_mode = #tpu.pipeline_mode<synchronous>, transform_indices = @transform_14, window_bounds = array<i64: 1, 128>}, {pipeline_mode = #tpu.pipeline_mode<synchronous>, transform_indices = @transform_15, window_bounds = array<i64: 40, 128>}, {transform_indices = @transform_16, window_bounds = array<i64: 128, 128>}]} {
    %c0_i32 = arith.constant 0 : i32
    %0 = arith.cmpi eq, %arg0, %c0_i32 : i32
    %1 = arith.extui %0 : i1 to i32
    %c0_i32_0 = arith.constant 0 : i32
    %2 = arith.cmpi ne, %1, %c0_i32_0 : i32
    scf.if %2 {
      %cst_35 = arith.constant 0.000000e+00 : f32
      %55 = vector.broadcast %cst_35 : f32 to vector<40x128xf32>
      %c0_36 = arith.constant 0 : index
      %c0_37 = arith.constant 0 : index
      %56 = vector.load %arg18[%c0_36, %c0_37] : memref<40x128xf32, #tpu.memory_space<vmem>>, vector<40x128xf32>
      tpu.vector_store %arg18[%c0_36, %c0_37], %55 {strides = array<i32>} : memref<40x128xf32, #tpu.memory_space<vmem>>, vector<40x128xf32>,
    } else {
    }
    %c0 = arith.constant 0 : index
    %c0_1 = arith.constant 0 : index
    %3 = vector.load %arg1[%c0, %c0_1] : memref<128x2xi32, #tpu.memory_space<vmem>>, vector<128x2xi32>
    %4 = vector.extract_strided_slice %3 {offsets = [0, 0], sizes = [128, 1], strides = [1, 1]} : vector<128x2xi32> to vector<128x1xi32>
    %5 = vector.extract_strided_slice %3 {offsets = [0, 1], sizes = [128, 1], strides = [1, 1]} : vector<128x2xi32> to vector<128x1xi32>
    %6 = tpu.iota {dimensions = array<i32: 1>} : vector<128x40xi32>
    %7 = vector.broadcast %4 : vector<128x1xi32> to vector<128x40xi32>
    %8 = arith.cmpi eq, %7, %6 : vector<128x40xi32>
    %9 = arith.extui %8 : vector<128x40xi1> to vector<128x40xi32>
    %10 = arith.sitofp %9 : vector<128x40xi32> to vector<128x40xf32>
    %11 = vector.broadcast %5 : vector<128x1xi32> to vector<128x40xi32>
    %12 = arith.cmpi eq, %11, %6 : vector<128x40xi32>
    %13 = arith.extui %12 : vector<128x40xi1> to vector<128x40xi32>
    %14 = arith.sitofp %13 : vector<128x40xi32> to vector<128x40xf32>
    %c0_2 = arith.constant 0 : index
    %c0_3 = arith.constant 0 : index
    %15 = vector.load %arg4[%c0_2, %c0_3] : memref<40x128xf32, #tpu.memory_space<vmem>>, vector<40x128xf32>
    %cst = arith.constant dense<0.000000e+00> : vector<128x128xf32>
    %16 = tpu.matmul %10, %15, %cst {dimension_numbers = #tpu.dot_dimension_numbers<[1], [0], [0], [1], [0, 0, 1, 1], [], []>} : vector<128x40xf32>, vector<40x128xf32>, vector<128x128xf32> -> vector<128x128xf32>
    %c0_4 = arith.constant 0 : index
    %c0_5 = arith.constant 0 : index
    %17 = vector.load %arg5[%c0_4, %c0_5] : memref<40x128xf32, #tpu.memory_space<vmem>>, vector<40x128xf32>
    %cst_6 = arith.constant dense<0.000000e+00> : vector<128x128xf32>
    %18 = tpu.matmul %14, %17, %cst_6 {dimension_numbers = #tpu.dot_dimension_numbers<[1], [0], [0], [1], [0, 0, 1, 1], [], []>} : vector<128x40xf32>, vector<40x128xf32>, vector<128x128xf32> -> vector<128x128xf32>
    %19 = arith.addf %16, %18 : vector<128x128xf32>
    %c0_7 = arith.constant 0 : index
    %c0_8 = arith.constant 0 : index
    %20 = vector.load %arg2[%c0_7, %c0_8] : memref<128x64xf32, #tpu.memory_space<vmem>>, vector<128x64xf32>
    %c0_9 = arith.constant 0 : index
    %c0_10 = arith.constant 0 : index
    %21 = vector.load %arg6[%c0_9, %c0_10] : memref<64x128xf32, #tpu.memory_space<vmem>>, vector<64x128xf32>
    %cst_11 = arith.constant dense<0.000000e+00> : vector<128x128xf32>
    %22 = tpu.matmul %20, %21, %cst_11 {dimension_numbers = #tpu.dot_dimension_numbers<[1], [0], [0], [1], [0, 0, 1, 1], [], []>} : vector<128x64xf32>, vector<64x128xf32>, vector<128x128xf32> -> vector<128x128xf32>
    %23 = arith.addf %19, %22 : vector<128x128xf32>
    %c0_12 = arith.constant 0 : index
    %c0_13 = arith.constant 0 : index
    %24 = vector.load %arg7[%c0_12, %c0_13] : memref<1x128xf32, #tpu.memory_space<vmem>>, vector<1x128xf32>
    %25 = vector.broadcast %24 : vector<1x128xf32> to vector<128x128xf32>
    %26 = arith.addf %23, %25 : vector<128x128xf32>
    %cst_14 = arith.constant 0.000000e+00 : f32
    %27 = vector.broadcast %cst_14 : f32 to vector<128x128xf32>
    %28 = arith.maximumf %26, %27 : vector<128x128xf32>
    %c0_15 = arith.constant 0 : index
    %c0_16 = arith.constant 0 : index
    %29 = vector.load %arg8[%c0_15, %c0_16] : memref<128x256xf32, #tpu.memory_space<vmem>>, vector<128x256xf32>
    %cst_17 = arith.constant dense<0.000000e+00> : vector<128x256xf32>
    %30 = tpu.matmul %28, %29, %cst_17 {dimension_numbers = #tpu.dot_dimension_numbers<[1], [0], [0], [1], [0, 0, 1, 1], [], []>} : vector<128x128xf32>, vector<128x256xf32>, vector<128x256xf32> -> vector<128x256xf32>
    %c0_18 = arith.constant 0 : index
    %c0_19 = arith.constant 0 : index
    %31 = vector.load %arg9[%c0_18, %c0_19] : memref<1x256xf32, #tpu.memory_space<vmem>>, vector<1x256xf32>
    %32 = vector.broadcast %31 : vector<1x256xf32> to vector<128x256xf32>
    %33 = arith.addf %30, %32 : vector<128x256xf32>
    %cst_20 = arith.constant 0.000000e+00 : f32
    %34 = vector.broadcast %cst_20 : f32 to vector<128x256xf32>
    %35 = arith.maximumf %33, %34 : vector<128x256xf32>
    %c0_21 = arith.constant 0 : index
    %c0_22 = arith.constant 0 : index
    %36 = vector.load %arg10[%c0_21, %c0_22] : memref<128x128xf32, #tpu.memory_space<vmem>>, vector<128x128xf32>
    %cst_23 = arith.constant dense<0.000000e+00> : vector<128x128xf32>
    %37 = tpu.matmul %28, %36, %cst_23 {dimension_numbers = #tpu.dot_dimension_numbers<[1], [0], [0], [1], [0, 0, 1, 1], [], []>} : vector<128x128xf32>, vector<128x128xf32>, vector<128x128xf32> -> vector<128x128xf32>
    %c0_24 = arith.constant 0 : index
    %c0_25 = arith.constant 0 : index
    %38 = vector.load %arg11[%c0_24, %c0_25] : memref<1x128xf32, #tpu.memory_space<vmem>>, vector<1x128xf32>
    %39 = vector.broadcast %38 : vector<1x128xf32> to vector<128x128xf32>
    %40 = arith.addf %37, %39 : vector<128x128xf32>
    %cst_26 = arith.constant 0.000000e+00 : f32
    %41 = vector.broadcast %cst_26 : f32 to vector<128x128xf32>
    %42 = arith.maximumf %40, %41 : vector<128x128xf32>
    %c0_27 = arith.constant 0 : index
    %c0_28 = arith.constant 0 : index
    %43 = vector.load %arg17[%c0_27, %c0_28] : memref<128x128xf32, #tpu.memory_space<vmem>>, vector<128x128xf32>
    tpu.vector_store %arg17[%c0_27, %c0_28], %42 {strides = array<i32>} : memref<128x128xf32, #tpu.memory_space<vmem>>, vector<128x128xf32>,
    %44 = vector.extract_strided_slice %35 {offsets = [0, 0], sizes = [128, 128], strides = [1, 1]} : vector<128x256xf32> to vector<128x128xf32>
    %45 = vector.extract_strided_slice %35 {offsets = [0, 128], sizes = [128, 128], strides = [1, 1]} : vector<128x256xf32> to vector<128x128xf32>
    %46 = tpu.concatenate %44, %45 in 0 : vector<128x128xf32>, vector<128x128xf32> -> vector<256x128xf32>
    %47 = tpu.concatenate %10, %14 in 0 : vector<128x40xf32>, vector<128x40xf32> -> vector<256x40xf32>
    %c0_29 = arith.constant 0 : index
    %c0_30 = arith.constant 0 : index
    %48 = vector.load %arg18[%c0_29, %c0_30] : memref<40x128xf32, #tpu.memory_space<vmem>>, vector<40x128xf32>
    %cst_31 = arith.constant dense<0.000000e+00> : vector<40x128xf32>
    %49 = tpu.matmul %47, %46, %cst_31 {dimension_numbers = #tpu.dot_dimension_numbers<[0], [0], [1], [1], [0, 1, 1, 1], [], []>} : vector<256x40xf32>, vector<256x128xf32>, vector<40x128xf32> -> vector<40x128xf32>
    %50 = arith.addf %48, %49 : vector<40x128xf32>
    %c0_32 = arith.constant 0 : index
    %c0_33 = arith.constant 0 : index
    %51 = vector.load %arg18[%c0_32, %c0_33] : memref<40x128xf32, #tpu.memory_space<vmem>>, vector<40x128xf32>
    tpu.vector_store %arg18[%c0_32, %c0_33], %50 {strides = array<i32>} : memref<40x128xf32, #tpu.memory_space<vmem>>, vector<40x128xf32>,
    %c2_i32 = arith.constant 2 : i32
    %52 = arith.cmpi eq, %arg0, %c2_i32 : i32
    %53 = arith.extui %52 : i1 to i32
    %c0_i32_34 = arith.constant 0 : i32
    %54 = arith.cmpi ne, %53, %c0_i32_34 : i32
    scf.if %54 {
      %c0_35 = arith.constant 0 : index
      %c0_36 = arith.constant 0 : index
      %55 = vector.load %arg18[%c0_35, %c0_36] : memref<40x128xf32, #tpu.memory_space<vmem>>, vector<40x128xf32>
      %c0_37 = arith.constant 0 : index
      %c0_38 = arith.constant 0 : index
      %56 = vector.load %arg3[%c0_37, %c0_38] : memref<40x1xf32, #tpu.memory_space<vmem>>, vector<40x1xf32>
      %57 = vector.broadcast %56 : vector<40x1xf32> to vector<40x128xf32>
      %58 = arith.mulf %55, %57 : vector<40x128xf32>
      %c0_39 = arith.constant 0 : index
      %c0_40 = arith.constant 0 : index
      %59 = vector.load %arg12[%c0_39, %c0_40] : memref<128x128xf32, #tpu.memory_space<vmem>>, vector<128x128xf32>
      %cst_41 = arith.constant dense<0.000000e+00> : vector<40x128xf32>
      %60 = tpu.matmul %58, %59, %cst_41 {dimension_numbers = #tpu.dot_dimension_numbers<[1], [0], [0], [1], [0, 0, 1, 1], [], []>} : vector<40x128xf32>, vector<128x128xf32>, vector<40x128xf32> -> vector<40x128xf32>
      %c0_42 = arith.constant 0 : index
      %c0_43 = arith.constant 0 : index
      %61 = vector.load %arg13[%c0_42, %c0_43] : memref<1x128xf32, #tpu.memory_space<vmem>>, vector<1x128xf32>
      %62 = vector.broadcast %61 : vector<1x128xf32> to vector<40x128xf32>
      %63 = arith.addf %60, %62 : vector<40x128xf32>
      %cst_44 = arith.constant 0.000000e+00 : f32
      %64 = vector.broadcast %cst_44 : f32 to vector<40x128xf32>
      %65 = arith.maximumf %63, %64 : vector<40x128xf32>
      %c0_45 = arith.constant 0 : index
      %c0_46 = arith.constant 0 : index
      %66 = vector.load %arg14[%c0_45, %c0_46] : memref<128x128xf32, #tpu.memory_space<vmem>>, vector<128x128xf32>
      %cst_47 = arith.constant dense<0.000000e+00> : vector<40x128xf32>
      %67 = tpu.matmul %65, %66, %cst_47 {dimension_numbers = #tpu.dot_dimension_numbers<[1], [0], [0], [1], [0, 0, 1, 1], [], []>} : vector<40x128xf32>, vector<128x128xf32>, vector<40x128xf32> -> vector<40x128xf32>
      %c0_48 = arith.constant 0 : index
      %c0_49 = arith.constant 0 : index
      %68 = vector.load %arg15[%c0_48, %c0_49] : memref<1x128xf32, #tpu.memory_space<vmem>>, vector<1x128xf32>
      %69 = vector.broadcast %68 : vector<1x128xf32> to vector<40x128xf32>
      %70 = arith.addf %67, %69 : vector<40x128xf32>
      %cst_50 = arith.constant 0.000000e+00 : f32
      %71 = vector.broadcast %cst_50 : f32 to vector<40x128xf32>
      %72 = arith.maximumf %70, %71 : vector<40x128xf32>
      %c0_51 = arith.constant 0 : index
      %c0_52 = arith.constant 0 : index
      %73 = vector.load %arg16[%c0_51, %c0_52] : memref<40x128xf32, #tpu.memory_space<vmem>>, vector<40x128xf32>
      tpu.vector_store %arg16[%c0_51, %c0_52], %72 {strides = array<i32>} : memref<40x128xf32, #tpu.memory_space<vmem>>, vector<40x128xf32>,
    } else {
    }
    return
  }
  func.func @transform_0(%arg0: i32) -> (i32, i32) {
    %c0_i32 = arith.constant 0 : i32
    %c0_i32_0 = arith.constant 0 : i32
    return %arg0, %c0_i32 : i32, i32
  }
  func.func @transform_1(%arg0: i32) -> (i32, i32) {
    %c0_i32 = arith.constant 0 : i32
    %c0_i32_0 = arith.constant 0 : i32
    return %arg0, %c0_i32 : i32, i32
  }
  func.func @transform_2(%arg0: i32) -> (i32, i32) {
    %c0_i32 = arith.constant 0 : i32
    %c0_i32_0 = arith.constant 0 : i32
    %c0_i32_1 = arith.constant 0 : i32
    return %c0_i32, %c0_i32_0 : i32, i32
  }
  func.func @transform_3(%arg0: i32) -> (i32, i32) {
    %c0_i32 = arith.constant 0 : i32
    %c0_i32_0 = arith.constant 0 : i32
    %c0_i32_1 = arith.constant 0 : i32
    return %c0_i32, %c0_i32_0 : i32, i32
  }
  func.func @transform_4(%arg0: i32) -> (i32, i32) {
    %c0_i32 = arith.constant 0 : i32
    %c0_i32_0 = arith.constant 0 : i32
    %c0_i32_1 = arith.constant 0 : i32
    return %c0_i32, %c0_i32_0 : i32, i32
  }
  func.func @transform_5(%arg0: i32) -> (i32, i32) {
    %c0_i32 = arith.constant 0 : i32
    %c0_i32_0 = arith.constant 0 : i32
    %c0_i32_1 = arith.constant 0 : i32
    return %c0_i32, %c0_i32_0 : i32, i32
  }
  func.func @transform_6(%arg0: i32) -> (i32, i32) {
    %c0_i32 = arith.constant 0 : i32
    %c0_i32_0 = arith.constant 0 : i32
    %c0_i32_1 = arith.constant 0 : i32
    return %c0_i32, %c0_i32_0 : i32, i32
  }
  func.func @transform_7(%arg0: i32) -> (i32, i32) {
    %c0_i32 = arith.constant 0 : i32
    %c0_i32_0 = arith.constant 0 : i32
    %c0_i32_1 = arith.constant 0 : i32
    return %c0_i32, %c0_i32_0 : i32, i32
  }
  func.func @transform_8(%arg0: i32) -> (i32, i32) {
    %c0_i32 = arith.constant 0 : i32
    %c0_i32_0 = arith.constant 0 : i32
    %c0_i32_1 = arith.constant 0 : i32
    return %c0_i32, %c0_i32_0 : i32, i32
  }
  func.func @transform_9(%arg0: i32) -> (i32, i32) {
    %c0_i32 = arith.constant 0 : i32
    %c0_i32_0 = arith.constant 0 : i32
    %c0_i32_1 = arith.constant 0 : i32
    return %c0_i32, %c0_i32_0 : i32, i32
  }
  func.func @transform_10(%arg0: i32) -> (i32, i32) {
    %c0_i32 = arith.constant 0 : i32
    %c0_i32_0 = arith.constant 0 : i32
    %c0_i32_1 = arith.constant 0 : i32
    return %c0_i32, %c0_i32_0 : i32, i32
  }
  func.func @transform_11(%arg0: i32) -> (i32, i32) {
    %c0_i32 = arith.constant 0 : i32
    %c0_i32_0 = arith.constant 0 : i32
    %c0_i32_1 = arith.constant 0 : i32
    return %c0_i32, %c0_i32_0 : i32, i32
  }
  func.func @transform_12(%arg0: i32) -> (i32, i32) {
    %c0_i32 = arith.constant 0 : i32
    %c0_i32_0 = arith.constant 0 : i32
    %c0_i32_1 = arith.constant 0 : i32
    return %c0_i32, %c0_i32_0 : i32, i32
  }
  func.func @transform_13(%arg0: i32) -> (i32, i32) {
    %c0_i32 = arith.constant 0 : i32
    %c0_i32_0 = arith.constant 0 : i32
    %c0_i32_1 = arith.constant 0 : i32
    return %c0_i32, %c0_i32_0 : i32, i32
  }
  func.func @transform_14(%arg0: i32) -> (i32, i32) {
    %c0_i32 = arith.constant 0 : i32
    %c0_i32_0 = arith.constant 0 : i32
    %c0_i32_1 = arith.constant 0 : i32
    return %c0_i32, %c0_i32_0 : i32, i32
  }
  func.func @transform_15(%arg0: i32) -> (i32, i32) {
    %c0_i32 = arith.constant 0 : i32
    %c0_i32_0 = arith.constant 0 : i32
    %c0_i32_1 = arith.constant 0 : i32
    return %c0_i32, %c0_i32_0 : i32, i32
  }
  func.func @transform_16(%arg0: i32) -> (i32, i32) {
    %c0_i32 = arith.constant 0 : i32
    %c0_i32_0 = arith.constant 0 : i32
    return %arg0, %c0_i32 : i32, i32
  }
}

</mosaic_0001>

<bundles_post_ra>
// kernel: tpu_custom_call.1
= control target key start
LH: loop header
LB: loop body
LE: loop exit
PB: predicated region body
PF: predicated region fallthrough
CT: control target
= control target key end

     0   :  { %s4398_s0 = inlined_call_operand.vmem [shape: s32[384,2], index: 0, kind: input, shape index: {}]   ;;  %s4399_s1 = inlined_call_operand.vmem [shape: f32[384,64], index: 1, kind: input, shape index: {}]   ;;  %s4400_s2 = inlined_call_operand.vmem [shape: f32[40,1], index: 2, kind: input, shape index: {}]   ;;  %s4401_s3 = inlined_call_operand.vmem [shape: f32[40,128], index: 3, kind: input, shape index: {}]   ;;  %s4402_s4 = inlined_call_operand.vmem [shape: f32[40,128], index: 4, kind: input, shape index: {}]   ;;  %s4403_s5 = inlined_call_operand.vmem [shape: f32[64,128], index: 5, kind: input, shape index: {}]   ;;  %s4404_s6 = inlined_call_operand.vmem [shape: f32[1,128], index: 6, kind: input, shape index: {}]   ;;  %s4405_s7 = inlined_call_operand.vmem [shape: f32[128,256], index: 7, kind: input, shape index: {}]   ;;  %s4406_s8 = inlined_call_operand.vmem [shape: f32[1,256], index: 8, kind: input, shape index: {}]   ;;  %s4407_s9 = inlined_call_operand.vmem [shape: f32[128,128], index: 9, kind: input, shape index: {}]   ;;  %s4408_s10 = inlined_call_operand.vmem [shape: f32[1,128], index: 10, kind: input, shape index: {}]   ;;  %s4409_s11 = inlined_call_operand.vmem [shape: f32[128,128], index: 11, kind: input, shape index: {}]   ;;  %s4410_s12 = inlined_call_operand.vmem [shape: f32[1,128], index: 12, kind: input, shape index: {}]   ;;  %s4411_s13 = inlined_call_operand.vmem [shape: f32[128,128], index: 13, kind: input, shape index: {}]   ;;  %s4412_s14 = inlined_call_operand.vmem [shape: f32[1,128], index: 14, kind: input, shape index: {}]   ;;  %s4413_s15 = inlined_call_operand.hbm [shape: f32[40,128], index: 15, kind: output, shape index: {0}]   ;;  %s4414_s16 = inlined_call_operand.hbm [shape: f32[384,128], index: 16, kind: output, shape index: {1}]  }
   0x1   :  { %4422 = sst [smem:[#allocation15_spill]] %s4398_s0 }
   0x2   :  { %4423 = sst [smem:[#allocation16_spill]] %s4399_s1 }
   0x3   :  { %4424 = sst [smem:[#allocation17_spill]] %s4400_s2 }
   0x4   :  { %22 = vsyncpa [#allocation4], 0 }
   0x5   :  { %23 = vsyncpa [#allocation6], 0 }
   0x6   :  { %25 = vsyncpa [#allocation6 + $0x1], 0  ;;  %s3505_s21 = smov 0   ;;  %s3507_s22 = smov 0  }
   0x7   :  { %s3509_s23 = smov 0   ;;  %s3511_s24 = smov 0  }
   0x8 LB: > { %4425 = sst [smem:[#allocation9_spill]] %s3394_s21  ;;  %s3526_s25 = sadd.s32 4294967295, %s3406_s24   ;;  %s3406_s24 = sphi %s3511_s24, %s4440_s24   ;;  %s3402_s23 = sphi %s3509_s23, %s4442_s23   ;;  %s3398_s22 = sphi %s3507_s22, %s4444_s22   ;;  %s3394_s21 = sphi %s3505_s21, %s4443_s21  }
   0x9   : > { %4426 = sst [smem:[#allocation10_spill]] %s3402_s23  ;;  %s2438_s26 = sadd.s32 4294967294, %s3406_s24  }
   0xa   : > { %4427 = sst [smem:[#allocation11_spill]] %s3406_s24  ;;  %s3530_s27 = sadd.s32 1, %s3406_s24  }
   0xb   : > { %4428 = sst [smem:[#allocation12_spill]] %s3530_s27  ;;  %s384_s28 = sadd.s32 1, %s3402_s23 }
   0xc   : > { %s381_s29 = ssub.s32 %s3406_s24, %s3530_s27  ;;  %p394_p0 = scmp.ne.s32.totalorder %s3402_s23, %s3398_s22 }
   0xd   : > { %p382_p1 = scmp.eq.s32.totalorder %s381_s29, 0  ;;  %p395_p2 = scmp.eq.s32.totalorder %s3526_s25, 2 }
   0xe   : > { %p400_p3 = scmp.ne.s32.totalorder %s3398_s22, %s3394_s21  ;;  %p401_p4 = scmp.eq.s32.totalorder %s2438_s26, 2 }
   0xf   : > { %s3541_s30 = scalar_select %p382_p1, %s3402_s23, %s384_s28  }
  0x10   : > { %p3545_p5 = por %p395_p2, %p394_p0  ;;  %p3549_p6 = por %p401_p4, %p400_p3 }
  0x11   : > { %4429 = sst [smem:[#allocation13_spill]] %s3541_s30  ;;  %p2441_p7 = scmp.ge.s32.totalorder %s3406_s24, 1 }
  0x12   : > { %s4431_s17 = scalar_select %p3549_p6, 1, 0 }
  0x13   : > { %p476_p8 = scmp.lt.s32.totalorder %s3406_s24, 4 }
  0x14   : > { %4432 = sst [smem:[#allocation14_spill]] %s4431_s17 }
  0x15   : > { %p477_p9 = pnand %p2441_p7, %p476_p8 }
  0x16   : > { %s4421_s18 = sand.u32 (!%p477_p9), 1, %s3398_s22   ;;  %s2443_s19 = sshll.u32 (!%p477_p9), %s3526_s25, 4 }
  0x17   : > { %480 = sbr.rel (%p477_p9) target bundleno = 1466 (0x5ba), region = 80  ;;  %s2442_s20 = sshll.u32 (!%p477_p9), %s4421_s18, 7 }
  0x18   : > { %p532_p10 = scmp.lt.s32.totalorder (!%p477_p9), %s2443_s19, 47  ;;  %s4433_s30 = sld [smem:[#allocation15_spill]] (!%p477_p9) }
  0x19   : > { %s4434_s1 = sld [smem:[#allocation16_spill]] (!%p477_p9)  ;;  %s3569_s24 = scalar_lea.vmem (!%p477_p9), [#allocation5], %s2442_s20 }
  0x1a   : > { %p2447_p11 = scmp.ne.s32.totalorder (!%p477_p9), %s3526_s25, 0 }
  0x1e   : > { %s4446_s19 = smov (!%p532_p10, %s2443_s19), 47  ;;  %547 = sbr.rel (%p2447_p11) target bundleno = 37 (0x25), region = 84 }
  0x1f   : > { %s2444_s26 = sshll.u32 %s4446_s19, 3  ;;  %v3408_v0 = vmov (!%p2447_p11), 0.0  }
  0x20   : > { %s3562_s23 = scalar_lea.vmem %s4433_s30, %s2444_s26  ;;  %s3567_s21 = scalar_lea.vmem %s4434_s1, %s2444_s26  ;;  %548 = vst [vmem:[#allocation2] sm:$0xff] (!%p2447_p11), %v3408_v0  ;;  %549 = vst [vmem:[#allocation2 + $0x8] sm:$0xff] (!%p2447_p11), %v3408_v0 }
  0x21   : > { %550 = vst [vmem:[#allocation2 + $0x10] sm:$0xff] (!%p2447_p11), %v3408_v0  ;;  %551 = vst [vmem:[#allocation2 + $0x18] sm:$0xff] (!%p2447_p11), %v3408_v0 }
  0x22   : > { %552 = vst [vmem:[#allocation2 + $0x20] sm:$0xff] (!%p2447_p11), %v3408_v0 }
  0x25 PF: > { %v555_v1 = vld [vmem:[%s3562_s23 + $0x10] sm:$0xff]  ;;  %v553_v2 = vld [vmem:[%s3562_s23] sm:$0xff]  ;;  %v3409_v3 = vmov 1   ;;  %v556_v4 = vld [vmem:[%s3562_s23 + $0x18] sm:$0xff]  ;;  %v3410_v6 = vmov 0.0   ;;  %v3411_v29 = vmov 0  }
  0x26   : > { %3251 = vset.pattern.permute.xlu1 %v3409_v3  ;;  %3250 = vset.pattern.permute.xlu0 %v3409_v3  ;;  %v554_v5 = vld [vmem:[%s3562_s23 + $0x8] sm:$0xff]  ;;  %v768_v7 = vld [vmem:[%s4402_s4] sm:$0xff]  ;;  %v770_v10 = vld [vmem:[%s4402_s4 + $0x10] sm:$0xff]  ;;  %vm773_vm0 = vcmask 326656   ;;  %p2530_p12 = scmp.ne.s32.totalorder %s3526_s25, 2 }
  0x27   : > { %674 = vperm.xlu1 %3251, %v555_v1   ;;  %668 = vperm.xlu0 %3250, %v553_v2   ;;  %v769_v8 = vld [vmem:[%s4402_s4 + $0x8] sm:$0xff]  ;;  %v771_v11 = vld [vmem:[%s4402_s4 + $0x18] sm:$0xff]  ;;  %v557_v13 = vld [vmem:[%s3562_s23 + $0x20] sm:$0xff]  ;;  %s4435_s2 = sld [smem:[#allocation17_spill]] (!%p2530_p12) }
  0x28   : > { %1541 = vmatprep.mubr.f32.mxu1 %v3410_v6  ;;  %v2986_v9 = vpack.c.bf16 %v769_v8, %v768_v7  ;;  %v558_v12 = vld [vmem:[%s3562_s23 + $0x28] sm:$0xff]  ;;  %v2990_v14 = vpack.c.bf16 %v771_v11, %v770_v10  ;;  %v560_v15 = vld [vmem:[%s3562_s23 + $0x38] sm:$0xff]  ;;  %v559_v16 = vld [vmem:[%s3562_s23 + $0x30] sm:$0xff]  ;;  %v569_v8 = vlaneseq }
  0x29   : > { %v772_v17 = vld [vmem:[%s4402_s4 + $0x20] sm:$0xff]  ;;  %v764_v19 = vld [vmem:[%s4401_s3 + $0x8] sm:$0xff]  ;;  %v564_v23 = vld [vmem:[%s3562_s23 + $0x58] sm:$0xff] }
  0x2a   : > { %2987 = vmatprep.subr.bf16.mxu0 %v2986_v9  ;;  %v763_v18 = vld [vmem:[%s4401_s3] sm:$0xff]  ;;  %v562_v20 = vld [vmem:[%s3562_s23 + $0x48] sm:$0xff]  ;;  %v563_v24 = vld [vmem:[%s3562_s23 + $0x50] sm:$0xff]  ;;  %v3701_v10 = vand.u32 127, %v569_v8 }
  0x2b   : > { %677 = vperm.xlu1 %3251, %v556_v4   ;;  %671 = vperm.xlu0 %3250, %v554_v5   ;;  %v561_v21 = vld [vmem:[%s3562_s23 + $0x40] sm:$0xff]  ;;  %v3606_v22 = vpack.c.bf16 %v764_v19, %v763_v18  ;;  %v566_v25 = vld [vmem:[%s3562_s23 + $0x68] sm:$0xff]  ;;  %v568_v27 = vld [vmem:[%s3562_s23 + $0x78] sm:$0xff] }
  0x2c   : > { %2989 = vmatpush3.bf16.msra.mxu0 %v2986_v9  ;;  %v565_v26 = vld [vmem:[%s3562_s23 + $0x60] sm:$0xff]  ;;  %v567_v28 = vld [vmem:[%s3562_s23 + $0x70] sm:$0xff]  ;;  %v1434_v30 = vld [vmem:[%s4405_s7 + $0x8] sm:$0xff] }
  0x2d   : > { %2991 = vmatprep.subr.bf16.mxu0 %v2990_v14  ;;  %v1436_v31 = vld [vmem:[%s4405_s7 + $0x18] sm:$0xff]  ;;  %v1433_v32 = vld [vmem:[%s4405_s7] sm:$0xff]  ;;  %v1435_v34 = vld [vmem:[%s4405_s7 + $0x10] sm:$0xff] }
  0x2e   : > { %v3018_v33 = vpack.c.bf16 %v1436_v31, %v1434_v30  ;;  %v1438_v35 = vld [vmem:[%s4405_s7 + $0x28] sm:$0xff]  ;;  %v1440_v36 = vld [vmem:[%s4405_s7 + $0x38] sm:$0xff]  ;;  %v3020_v37 = vpack.c.bf16 %v1435_v34, %v1433_v32  ;;  %v1437_v39 = vld [vmem:[%s4405_s7 + $0x20] sm:$0xff] }
  0x2f   : > { %683 = vperm.xlu1 %3251, %v558_v12   ;;  %680 = vperm.xlu0 %3250, %v557_v13   ;;  %v3022_v38 = vpack.c.bf16 %v1440_v36, %v1438_v35  ;;  %v1439_v40 = vld [vmem:[%s4405_s7 + $0x30] sm:$0xff]  ;;  %v1442_v41 = vld [vmem:[%s4405_s7 + $0x48] sm:$0xff]  ;;  %v1444_v42 = vld [vmem:[%s4405_s7 + $0x58] sm:$0xff] }
  0x30   : > { %2993 = vmatpush3.bf16.msra.mxu0 %v2990_v14  ;;  %3019 = vmatprep.subr.bf16.mxu1 %v3018_v33  ;;  %v3024_v43 = vpack.c.bf16 %v1439_v40, %v1437_v39  ;;  %v3026_v44 = vpack.c.bf16 %v1444_v42, %v1442_v41  ;;  %v1441_v45 = vld [vmem:[%s4405_s7 + $0x40] sm:$0xff]  ;;  %v1443_v46 = vld [vmem:[%s4405_s7 + $0x50] sm:$0xff]  ;;  %v1446_v47 = vld [vmem:[%s4405_s7 + $0x68] sm:$0xff] }
  0x31   : > { %2736 = vmatprep.subr.mxu0 %v772_v17  ;;  %3021 = vmatpush1.bf16.msra.mxu1 %v3020_v37  ;;  %v1448_v48 = vld [vmem:[%s4405_s7 + $0x78] sm:$0xff]  ;;  %v3028_v49 = vpack.c.bf16 %v1443_v46, %v1441_v45  ;;  %v1445_v51 = vld [vmem:[%s4405_s7 + $0x60] sm:$0xff]  ;;  %v1447_v52 = vld [vmem:[%s4405_s7 + $0x70] sm:$0xff] }
  0x32   : > { %3023 = vmatprep.subr.bf16.mxu1 %v3022_v38  ;;  %v3030_v50 = vpack.c.bf16 %v1448_v48, %v1446_v47  ;;  %v1450_v53 = vld [vmem:[%s4405_s7 + $0x88] sm:$0xff]  ;;  %v1452_v54 = vld [vmem:[%s4405_s7 + $0x98] sm:$0xff]  ;;  %v3032_v55 = vpack.c.bf16 %v1447_v52, %v1445_v51  ;;  %v1449_v57 = vld [vmem:[%s4405_s7 + $0x80] sm:$0xff] }
  0x33   : > { %689 = vperm.xlu1 %3251, %v560_v15   ;;  %686 = vperm.xlu0 %3250, %v559_v16   ;;  %v3034_v56 = vpack.c.bf16 %v1452_v54, %v1450_v53  ;;  %v1451_v58 = vld [vmem:[%s4405_s7 + $0x90] sm:$0xff]  ;;  %v1454_v59 = vld [vmem:[%s4405_s7 + $0xa8] sm:$0xff]  ;;  %v1456_v60 = vld [vmem:[%s4405_s7 + $0xb8] sm:$0xff] }
  0x34   : > { %2737 = vmatpush3.msra.mxu0 %v772_v17  ;;  %v3036_v61 = vpack.c.bf16 %v1451_v58, %v1449_v57  ;;  %v3038_v62 = vpack.c.bf16 %v1456_v60, %v1454_v59  ;;  %v1453_v63 = vld [vmem:[%s4405_s7 + $0xa0] sm:$0xff]  ;;  %v1455_v0 = vld [vmem:[%s4405_s7 + $0xb0] sm:$0xff]  ;;  %v1179_v53 = vld [vmem:[%s4403_s5 + $0x18] sm:$0xff] }
  0x35   : > { %2995 = vmatprep.subr.bf16.mxu0 %v3606_v22  ;;  %3025 = vmatpush1.bf16.msra.mxu1 %v3024_v43  ;;  %v1459_v7 = vld [vmem:[%s4405_s7 + $0xd0] sm:$0xff]  ;;  %v1180_v60 = vld [vmem:[%s4403_s5 + $0x20] sm:$0xff] }
  0x36   : > { %3027 = vmatprep.subr.bf16.mxu1 %v3026_v44  ;;  %v765_v14 = vld [vmem:[%s4401_s3 + $0x10] sm:$0xff] }
  0x37   : > { %695 = vperm.xlu1 %3251, %v562_v20   ;;  %692 = vperm.xlu0 %3250, %v561_v21   ;;  %v1178_v52 = vld [vmem:[%s4403_s5 + $0x10] sm:$0xff] }
  0x38   : > { %v3006_v59 = vpack.c.bf16 %v1179_v53, %v1178_v52  ;;  %v1165_v52 = vld [vmem:[%s3567_s21 + $0x28] sm:$0xff]  ;;  %v1166_v53 = vld [vmem:[%s3567_s21 + $0x30] sm:$0xff] }
  0x39   : > { %3029 = vmatpush1.bf16.msra.mxu1 %v3028_v49 }
  0x3a   : > { %3031 = vmatprep.subr.bf16.mxu1 %v3030_v50 }
  0x3b   : > { %701 = vperm.xlu1 %3251, %v564_v23   ;;  %698 = vperm.xlu0 %3250, %v563_v24  }
  0x3d   : > { %3033 = vmatpush1.bf16.msra.mxu1 %v3032_v55 }
  0x3e   : > { %3035 = vmatprep.subr.bf16.mxu1 %v3034_v56 }
  0x3f   : > { %707 = vperm.xlu1 %3251, %v566_v25   ;;  %704 = vperm.xlu0 %3250, %v565_v26  }
  0x41   : > { %3037 = vmatpush1.bf16.msra.mxu1 %v3036_v61  ;;  %v1181_v61 = vld [vmem:[%s4403_s5 + $0x28] sm:$0xff] }
  0x42   : > { %3039 = vmatprep.subr.bf16.mxu1 %v3038_v62 }
  0x43   : > { %713 = vperm.xlu1 %3251, %v568_v27   ;;  %710 = vperm.xlu0 %3250, %v567_v28  }
  0x47   : > { %3253 = vset.pattern.permute.xlu1 %v3411_v29  ;;  %3252 = vset.pattern.permute.xlu0 %v3411_v29 }
  0x48   : > { %575 = vperm.xlu1 %3253, %v554_v5   ;;  %572 = vperm.xlu0 %3252, %v553_v2   ;;  %v1460_v2 = vld [vmem:[%s4405_s7 + $0xd8] sm:$0xff]  ;;  %v1457_v5 = vld [vmem:[%s4405_s7 + $0xc0] sm:$0xff] }
  0x49   : > { %v3044_v9 = vpack.c.bf16 %v1459_v7, %v1457_v5  ;;  %v1183_v5 = vld [vmem:[%s4403_s5 + $0x38] sm:$0xff] }
  0x4c   : > { %578 = vperm.xlu1 %3253, %v555_v1   ;;  %581 = vperm.xlu0 %3252, %v556_v4   ;;  %v1458_v1 = vld [vmem:[%s4405_s7 + $0xc8] sm:$0xff] }
  0x4d   : > { %v3042_v4 = vpack.c.bf16 %v1460_v2, %v1458_v1  ;;  %v3010_v2 = vpack.c.bf16 %v1181_v61, %v1180_v60  ;;  %v1174_v61 = vld [vmem:[%s3567_s21 + $0x70] sm:$0xff] }
  0x50   : > { %584 = vperm.xlu1 %3253, %v557_v13   ;;  %587 = vperm.xlu0 %3252, %v558_v12  }
  0x54   : > { %590 = vperm.xlu1 %3253, %v559_v16   ;;  %593 = vperm.xlu0 %3252, %v560_v15   ;;  %v766_v15 = vld [vmem:[%s4401_s3 + $0x18] sm:$0xff] }
  0x55   : > { %v2998_v18 = vpack.c.bf16 %v766_v15, %v765_v14 }
  0x58   : > { %596 = vperm.xlu1 %3253, %v561_v21   ;;  %599 = vperm.xlu0 %3252, %v562_v20  }
  0x5c   : > { %602 = vperm.xlu1 %3253, %v563_v24   ;;  %605 = vperm.xlu0 %3252, %v564_v23  }
  0x60   : > { %608 = vperm.xlu1 %3253, %v565_v26   ;;  %611 = vperm.xlu0 %3252, %v566_v25   ;;  %v767_v26 = vld [vmem:[%s4401_s3 + $0x20] sm:$0xff] }
  0x64   : > { %614 = vperm.xlu1 %3253, %v567_v28   ;;  %617 = vperm.xlu0 %3252, %v568_v27   ;;  %v1176_v27 = vld [vmem:[%s4403_s5] sm:$0xff] }
  0x68   : > { %3311 = vset.pattern.permute.xlu0 %v3409_v3  ;;  %v3040_v3 = vpack.c.bf16 %v1455_v0, %v1453_v63 }
  0x6a   : > { %3041 = vmatpush1.bf16.msra.mxu1 %v3040_v3 }
  0x6b   : > { %3043 = vmatprep.subr.bf16.mxu1 %v3042_v4  ;;  %v1182_v4 = vld [vmem:[%s4403_s5 + $0x30] sm:$0xff] }
  0x6e   : > { %3045 = vmatpush1.bf16.msra.mxu1 %v3044_v9 }
  0xa6   : > { %v675_v11 = vpop.permute.xlu1 %674  ;;  %v669_v12 = vpop.permute.xlu0 %668 }
  0xa7   : > { %vm715_vm1 = vcmp.eq.s32.totalorder %v669_v12, %v3701_v10  ;;  %vm717_vm2 = vcmp.eq.s32.totalorder %v675_v11, %v3701_v10 }
  0xa8   : > { %v3705_v13 = vsel %vm715_vm1, 1.0, %v3410_v6  ;;  %v3721_v20 = vsel %vm717_vm2, 1.0, %v3410_v6 }
  0xa9   : > { %2738 = vmatprep.mubr.msk.f32.mxu0 %vm773_vm0, %v3705_v13 }
  0xaa   : > { %v678_v16 = vpop.permute.xlu1 %677  ;;  %v672_v17 = vpop.permute.xlu0 %671 }
  0xab   : > { %vm716_vm3 = vcmp.eq.s32.totalorder %v672_v17, %v3701_v10  ;;  %vm718_vm4 = vcmp.eq.s32.totalorder %v678_v16, %v3701_v10 }
  0xac   : > { %v3718_v19 = vsel %vm716_vm3, 1.0, %v3410_v6  ;;  %v3731_v24 = vsel %vm718_vm4, 1.0, %v3410_v6 }
  0xad   : > { %2739 = vmatmul.mubr.msk.f32.vlgmr.msra.gmra.mrb[0].mxu0 %vm773_vm0, %v3718_v19 }
  0xae   : > { %v684_v21 = vpop.permute.xlu1 %683  ;;  %2741 = vmatprep.mubr.msk.f32.mxu0 %vm773_vm0, %v3721_v20  ;;  %2997 = vmatpush3.bf16.msra.mxu0 %v3606_v22  ;;  %v681_v23 = vpop.permute.xlu0 %680  ;;  %v1177_v22 = vld [vmem:[%s4403_s5 + $0x8] sm:$0xff] }
  0xaf   : > { %vm719_vm5 = vcmp.eq.s32.totalorder %v681_v23, %v3701_v10  ;;  %2999 = vmatprep.subr.bf16.mxu0 %v2998_v18  ;;  %vm720_vm6 = vcmp.eq.s32.totalorder %v684_v21, %v3701_v10  ;;  %v3751_v30 = vpack.c.bf16 %v1177_v22, %v1176_v27 }
  0xb0   : > { %v3734_v25 = vsel %vm719_vm5, 1.0, %v3410_v6  ;;  %v3754_v31 = vsel %vm720_vm6, 1.0, %v3410_v6 }
  0xb1   : > { %2742 = vmatmul.mubr.msk.f32.gmra.mrb[2].mxu0 %vm773_vm0, %v3731_v24 }
  0xb2   : > { %v690_v28 = vpop.permute.xlu1 %689  ;;  %2744 = vmatprep.mubr.msk.f32.mxu0 %vm773_vm0, %v3734_v25  ;;  %v687_v29 = vpop.permute.xlu0 %686  ;;  %3001 = vmatpush3.bf16.msra.mxu0 %v2998_v18 }
  0xb3   : > { %vm721_vm7 = vcmp.eq.s32.totalorder %v687_v29, %v3701_v10  ;;  %2770 = vmatprep.subr.mxu0 %v767_v26  ;;  %vm722_vm8 = vcmp.eq.s32.totalorder %v690_v28, %v3701_v10 }
  0xb4   : > { %v3757_v32 = vsel %vm721_vm7, 1.0, %v3410_v6  ;;  %v3767_v35 = vsel %vm722_vm8, 1.0, %v3410_v6 }
  0xb5   : > { %2745 = vmatmul.mubr.msk.f32.gmra.mrb[4].mxu0 %vm773_vm0, %v3754_v31 }
  0xb6   : > { %v696_v33 = vpop.permute.xlu1 %695  ;;  %2747 = vmatprep.mubr.msk.f32.mxu0 %vm773_vm0, %v3757_v32  ;;  %v693_v34 = vpop.permute.xlu0 %692  ;;  %2771 = vmatpush3.msra.mxu0 %v767_v26 }
  0xb7   : > { %vm723_vm9 = vcmp.eq.s32.totalorder %v693_v34, %v3701_v10  ;;  %3003 = vmatprep.subr.bf16.mxu0 %v3751_v30  ;;  %vm724_vm10 = vcmp.eq.s32.totalorder %v696_v33, %v3701_v10 }
  0xb8   : > { %v3770_v36 = vsel %vm723_vm9, 1.0, %v3410_v6  ;;  %v3779_v39 = vsel %vm724_vm10, 1.0, %v3410_v6 }
  0xb9   : > { %2748 = vmatmul.mubr.msk.f32.gmra.mrb[6].mxu0 %vm773_vm0, %v3767_v35 }
  0xba   : > { %v702_v37 = vpop.permute.xlu1 %701  ;;  %2750 = vmatprep.mubr.msk.f32.mxu0 %vm773_vm0, %v3770_v36  ;;  %v699_v38 = vpop.permute.xlu0 %698 }
  0xbb   : > { %vm725_vm11 = vcmp.eq.s32.totalorder %v699_v38, %v3701_v10  ;;  %vm726_vm12 = vcmp.eq.s32.totalorder %v702_v37, %v3701_v10 }
  0xbc   : > { %v3782_v40 = vsel %vm725_vm11, 1.0, %v3410_v6  ;;  %v3791_v43 = vsel %vm726_vm12, 1.0, %v3410_v6 }
  0xbd   : > { %2751 = vmatmul.mubr.msk.f32.gmra.mrb[8].mxu0 %vm773_vm0, %v3779_v39 }
  0xbe   : > { %v708_v41 = vpop.permute.xlu1 %707  ;;  %2753 = vmatprep.mubr.msk.f32.mxu0 %vm773_vm0, %v3782_v40  ;;  %v705_v42 = vpop.permute.xlu0 %704 }
  0xbf   : > { %vm727_vm13 = vcmp.eq.s32.totalorder %v705_v42, %v3701_v10  ;;  %vm728_vm14 = vcmp.eq.s32.totalorder %v708_v41, %v3701_v10  ;;  %v1160_v41 = vld [vmem:[%s3567_s21] sm:$0xff] }
  0xc0   : > { %v3794_v44 = vsel %vm727_vm13, 1.0, %v3410_v6  ;;  %v3803_v47 = vsel %vm728_vm14, 1.0, %v3410_v6 }
  0xc1   : > { %2754 = vmatmul.mubr.msk.f32.gmra.mrb[10].mxu0 %vm773_vm0, %v3791_v43 }
  0xc2   : > { %v714_v45 = vpop.permute.xlu1 %713  ;;  %2756 = vmatprep.mubr.msk.f32.mxu0 %vm773_vm0, %v3794_v44  ;;  %v711_v46 = vpop.permute.xlu0 %710 }
  0xc3   : > { %vm729_vm15 = vcmp.eq.s32.totalorder %v711_v46, %v3701_v10  ;;  %vm730_vm1 = vcmp.eq.s32.totalorder %v714_v45, %v3701_v10  ;;  %v1162_v46 = vld [vmem:[%s3567_s21 + $0x10] sm:$0xff] }
  0xc4   : > { %v3806_v48 = vsel %vm729_vm15, 1.0, %v3410_v6  ;;  %v3814_v51 = vsel %vm730_vm1, 1.0, %v3410_v6 }
  0xc5   : > { %2757 = vmatmul.mubr.msk.f32.gmra.mrb[12].mxu0 %vm773_vm0, %v3803_v47 }
  0xc6   : > { %2759 = vmatprep.mubr.msk.f32.mxu0 %vm773_vm0, %v3806_v48 }
  0xc7   : > { %v576_v49 = vpop.permute.xlu1 %575  ;;  %v573_v50 = vpop.permute.xlu0 %572 }
  0xc8   : > { %vm620_vm2 = vcmp.eq.s32.totalorder %v576_v49, %v3701_v10  ;;  %vm619_vm3 = vcmp.eq.s32.totalorder %v573_v50, %v3701_v10  ;;  %v1163_v49 = vld [vmem:[%s3567_s21 + $0x18] sm:$0xff]  ;;  %v1164_v50 = vld [vmem:[%s3567_s21 + $0x20] sm:$0xff] }
  0xc9   : > { %v2448_v54 = vsel %vm619_vm3, 1.0, %v3410_v6  ;;  %2760 = vmatmul.mubr.msk.f32.gmra.mrb[14].mxu0 %vm773_vm0, %v3814_v51  ;;  %v2449_v56 = vsel %vm620_vm2, 1.0, %v3410_v6  ;;  %vm1184_vm3 = vcmask 523264  }
  0xca   : > { %v3254_v55 = vpack.i.bf16 %v2448_v54, %v3705_v13  ;;  %2772 = vmatprep.mubr.msk.f32.mxu0 %vm773_vm0, %v2448_v54  ;;  %v3256_v63 = vpack.i.bf16 %v2449_v56, %v3718_v19  ;;  %v3014_v13 = vpack.c.bf16 %v1183_v5, %v1182_v4  ;;  %v1167_v54 = vld [vmem:[%s3567_s21 + $0x38] sm:$0xff]  ;;  %v1671_v4 = vld [vmem:[%s4407_s9 + $0x8] sm:$0xff] }
  0xcb   : > { %v579_v57 = vpop.permute.xlu1 %578  ;;  %v582_v58 = vpop.permute.xlu0 %581 }
  0xcc   : > { %vm621_vm4 = vcmp.eq.s32.totalorder %v579_v57, %v3701_v10  ;;  %3255 = vxpose.xlu1.b32.start [1/16] (narrow) %v3254_v55, 40  ;;  %vm622_vm5 = vcmp.eq.s32.totalorder %v582_v58, %v3701_v10  ;;  %v1168_v55 = vld [vmem:[%s3567_s21 + $0x40] sm:$0xff]  ;;  %v1170_v57 = vld [vmem:[%s3567_s21 + $0x50] sm:$0xff]  ;;  %v1171_v58 = vld [vmem:[%s3567_s21 + $0x58] sm:$0xff] }
  0xcd   : > { %v2450_v62 = vsel %vm621_vm4, 1.0, %v3410_v6  ;;  %2773 = vmatmul.mubr.msk.f32.vlgmr.msra.gmra.mrb[0].mxu0 %vm773_vm0, %v2449_v56  ;;  %v2451_v3 = vsel %vm622_vm5, 1.0, %v3410_v6  ;;  %v1169_v56 = vld [vmem:[%s3567_s21 + $0x48] sm:$0xff] }
  0xce   : > { %2775 = vmatprep.mubr.msk.f32.mxu0 %vm773_vm0, %v2450_v62  ;;  %3005 = vmatpush3.bf16.msra.mxu0 %v3751_v30  ;;  %v3258_v9 = vpack.i.bf16 %v2450_v62, %v3721_v20  ;;  %v3260_v16 = vpack.i.bf16 %v2451_v3, %v3731_v24 }
  0xcf   : > { %v585_v0 = vpop.permute.xlu1 %584  ;;  %v588_v1 = vpop.permute.xlu0 %587  ;;  %3007 = vmatprep.subr.bf16.mxu0 %v3006_v59 }
  0xd0   : > { %vm623_vm6 = vcmp.eq.s32.totalorder %v585_v0, %v3701_v10  ;;  %3257 = vxpose.xlu1.b32.cont [2/16] (narrow) %v3256_v63, 40  ;;  %vm624_vm7 = vcmp.eq.s32.totalorder %v588_v1, %v3701_v10  ;;  %v1462_v63 = vld [vmem:[%s4405_s7 + $0xe8] sm:$0xff]  ;;  %v1461_v1 = vld [vmem:[%s4405_s7 + $0xe0] sm:$0xff] }
  0xd1   : > { %v2452_v7 = vsel %vm623_vm6, 1.0, %v3410_v6  ;;  %2776 = vmatmul.mubr.msk.f32.gmra.mrb[2].mxu0 %vm773_vm0, %v2451_v3  ;;  %v2453_v14 = vsel %vm624_vm7, 1.0, %v3410_v6  ;;  %v1670_v3 = vld [vmem:[%s4407_s9] sm:$0xff] }
  0xd2   : > { %2778 = vmatprep.mubr.msk.f32.mxu0 %vm773_vm0, %v2452_v7  ;;  %3009 = vmatpush3.bf16.msra.mxu0 %v3006_v59  ;;  %v3262_v21 = vpack.i.bf16 %v2452_v7, %v3734_v25  ;;  %v3264_v22 = vpack.i.bf16 %v2453_v14, %v3754_v31  ;;  %v1172_v59 = vld [vmem:[%s3567_s21 + $0x60] sm:$0xff]  ;;  %v3050_v5 = vpack.c.bf16 %v1671_v4, %v1670_v3 }
  0xd3   : > { %v591_v11 = vpop.permute.xlu1 %590  ;;  %v594_v12 = vpop.permute.xlu0 %593  ;;  %3011 = vmatprep.subr.bf16.mxu0 %v3010_v2  ;;  %v3954_v7 = vld [vmem:[%s4404_s6] ss:$0 sm:$0xff] }
  0xd4   : > { %vm625_vm8 = vcmp.eq.s32.totalorder %v591_v11, %v3701_v10  ;;  %3259 = vxpose.xlu1.b32.cont [3/16] (narrow) %v3258_v9, 40  ;;  %vm626_vm9 = vcmp.eq.s32.totalorder %v594_v12, %v3701_v10  ;;  %v1672_v12 = vld [vmem:[%s4407_s9 + $0x10] sm:$0xff] }
  0xd5   : > { %v2454_v15 = vsel %vm625_vm8, 1.0, %v3410_v6  ;;  %2779 = vmatmul.mubr.msk.f32.gmra.mrb[4].mxu0 %vm773_vm0, %v2453_v14  ;;  %v2455_v19 = vsel %vm626_vm9, 1.0, %v3410_v6 }
  0xd6   : > { %2781 = vmatprep.mubr.msk.f32.mxu0 %vm773_vm0, %v2454_v15  ;;  %3013 = vmatpush3.bf16.msra.mxu0 %v3010_v2  ;;  %v3266_v33 = vpack.i.bf16 %v2454_v15, %v3757_v32  ;;  %v3268_v32 = vpack.i.bf16 %v2455_v19, %v3767_v35 }
  0xd7   : > { %v597_v17 = vpop.permute.xlu1 %596  ;;  %v600_v18 = vpop.permute.xlu0 %599  ;;  %3015 = vmatprep.subr.bf16.mxu0 %v3014_v13 }
  0xd8   : > { %vm627_vm10 = vcmp.eq.s32.totalorder %v597_v17, %v3701_v10  ;;  %3261 = vxpose.xlu1.b32.cont [4/16] (narrow) %v3260_v16, 40  ;;  %vm628_vm11 = vcmp.eq.s32.totalorder %v600_v18, %v3701_v10 }
  0xd9   : > { %v2456_v20 = vsel %vm627_vm10, 1.0, %v3410_v6  ;;  %2782 = vmatmul.mubr.msk.f32.gmra.mrb[6].mxu0 %vm773_vm0, %v2455_v19  ;;  %v2457_v26 = vsel %vm628_vm11, 1.0, %v3410_v6 }
  0xda   : > { %2784 = vmatprep.mubr.msk.f32.mxu0 %vm773_vm0, %v2456_v20  ;;  %3017 = vmatpush3.bf16.msra.mxu0 %v3014_v13  ;;  %v3270_v45 = vpack.i.bf16 %v2456_v20, %v3770_v36  ;;  %v3272_v35 = vpack.i.bf16 %v2457_v26, %v3779_v39  ;;  %v1673_v13 = vld [vmem:[%s4407_s9 + $0x18] sm:$0xff]  ;;  %v1674_v20 = vld [vmem:[%s4407_s9 + $0x20] sm:$0xff] }
  0xdb   : > { %v603_v23 = vpop.permute.xlu1 %602  ;;  %v606_v24 = vpop.permute.xlu0 %605  ;;  %v3054_v18 = vpack.c.bf16 %v1673_v13, %v1672_v12 }
  0xdc   : > { %vm629_vm12 = vcmp.eq.s32.totalorder %v603_v23, %v3701_v10  ;;  %3263 = vxpose.xlu1.b32.cont [5/16] (narrow) %v3262_v21, 40  ;;  %vm630_vm13 = vcmp.eq.s32.totalorder %v606_v24, %v3701_v10  ;;  %v1675_v21 = vld [vmem:[%s4407_s9 + $0x28] sm:$0xff] }
  0xdd   : > { %v2458_v27 = vsel %vm629_vm12, 1.0, %v3410_v6  ;;  %2785 = vmatmul.mubr.msk.f32.gmra.mrb[8].mxu0 %vm773_vm0, %v2457_v26  ;;  %v2459_v29 = vsel %vm630_vm13, 1.0, %v3410_v6 }
  0xde   : > { %2787 = vmatprep.mubr.msk.f32.mxu0 %vm773_vm0, %v2458_v27  ;;  %v3274_v36 = vpack.i.bf16 %v2458_v27, %v3782_v40  ;;  %v3276_v39 = vpack.i.bf16 %v2459_v29, %v3791_v43  ;;  %v3058_v27 = vpack.c.bf16 %v1675_v21, %v1674_v20 }
  0xdf   : > { %v609_v25 = vpop.permute.xlu1 %608  ;;  %v612_v28 = vpop.permute.xlu0 %611 }
  0xe0   : > { %vm631_vm14 = vcmp.eq.s32.totalorder %v609_v25, %v3701_v10  ;;  %3265 = vxpose.xlu1.b32.cont [6/16] (narrow) %v3264_v22, 40  ;;  %vm632_vm15 = vcmp.eq.s32.totalorder %v612_v28, %v3701_v10  ;;  %v1676_v25 = vld [vmem:[%s4407_s9 + $0x30] sm:$0xff]  ;;  %v1677_v28 = vld [vmem:[%s4407_s9 + $0x38] sm:$0xff] }
  0xe1   : > { %v2460_v30 = vsel %vm631_vm14, 1.0, %v3410_v6  ;;  %2788 = vmatmul.mubr.msk.f32.gmra.mrb[10].mxu0 %vm773_vm0, %v2459_v29  ;;  %v2461_v37 = vsel %vm632_vm15, 1.0, %v3410_v6 }
  0xe2   : > { %2790 = vmatprep.mubr.msk.f32.mxu0 %vm773_vm0, %v2460_v30  ;;  %v3278_v40 = vpack.i.bf16 %v2460_v30, %v3794_v44  ;;  %v3280_v43 = vpack.i.bf16 %v2461_v37, %v3803_v47  ;;  %v1173_v44 = vld [vmem:[%s3567_s21 + $0x68] sm:$0xff]  ;;  %v1175_v47 = vld [vmem:[%s3567_s21 + $0x78] sm:$0xff] }
  0xe3   : > { %v615_v31 = vpop.permute.xlu1 %614  ;;  %v618_v34 = vpop.permute.xlu0 %617 }
  0xe4   : > { %vm633_vm1 = vcmp.eq.s32.totalorder %v615_v31, %v3701_v10  ;;  %3267 = vxpose.xlu1.b32.cont [7/16] (narrow) %v3266_v33, 40  ;;  %vm634_vm2 = vcmp.eq.s32.totalorder %v618_v34, %v3701_v10  ;;  %v1161_v10 = vld [vmem:[%s3567_s21 + $0x8] sm:$0xff]  ;;  %v3062_v31 = vpack.c.bf16 %v1677_v28, %v1676_v25 }
  0xe5   : > { %v2462_v38 = vsel %vm633_vm1, 1.0, %v3410_v6  ;;  %2791 = vmatmul.mubr.msk.f32.gmra.mrb[12].mxu0 %vm773_vm0, %v2461_v37  ;;  %v2463_v42 = vsel %vm634_vm2, 1.0, %v3410_v6  ;;  %v1678_v37 = vld [vmem:[%s4407_s9 + $0x40] sm:$0xff] }
  0xe6   : > { %2793 = vmatprep.mubr.msk.f32.mxu0 %vm773_vm0, %v2462_v38  ;;  %v3282_v60 = vpack.i.bf16 %v2462_v38, %v3806_v48  ;;  %v3284_v62 = vpack.i.bf16 %v2463_v42, %v3814_v51  ;;  %v1464_v48 = vld [vmem:[%s4405_s7 + $0xf8] sm:$0xff]  ;;  %v1463_v51 = vld [vmem:[%s4405_s7 + $0xf0] sm:$0xff]  ;;  %v1679_v38 = vld [vmem:[%s4407_s9 + $0x48] sm:$0xff] }
  0xe7   : > { %v3046_v0 = vpack.c.bf16 %v1464_v48, %v1462_v63  ;;  %v3048_v2 = vpack.c.bf16 %v1463_v51, %v1461_v1 }
  0xe8   : > { %3269 = vxpose.xlu1.b32.cont [8/16] (narrow) %v3268_v32, 40 }
  0xe9   : > { %2794 = vmatmul.mubr.msk.f32.gmra.mrb[14].mxu0 %vm773_vm0, %v2463_v42  ;;  %3047 = vmatprep.subr.bf16.mxu1 %v3046_v0  ;;  %vm3414_vm0 = vmmov (!%p2530_p12), 0  }
  0xea   : > { %2812 = vmatprep.mubr.msk.f32.mxu0 %vm1184_vm3, %v1160_v41  ;;  %3049 = vmatpush1.bf16.msra.mxu1 %v3048_v2 }
  0xeb   : > { %3051 = vmatprep.subr.bf16.mxu1 %v3050_v5 }
  0xec   : > { %3271 = vxpose.xlu1.b32.cont [9/16] (narrow) %v3270_v45, 40  ;;  %v3066_v45 = vpack.c.bf16 %v1679_v38, %v1678_v37 }
  0xed   : > { %2813 = vmatmul.mubr.msk.f32.vlgmr.msra.gmra.mrb[0].mxu0 %vm1184_vm3, %v1161_v10 }
  0xee   : > { %2815 = vmatprep.mubr.msk.f32.mxu0 %vm1184_vm3, %v1162_v46  ;;  %v1680_v46 = vld [vmem:[%s4407_s9 + $0x50] sm:$0xff] }
  0xf0   : > { %3273 = vxpose.xlu1.b32.cont [10/16] (narrow) %v3272_v35, 40  ;;  %v1681_v35 = vld [vmem:[%s4407_s9 + $0x58] sm:$0xff] }
  0xf1   : > { %2816 = vmatmul.mubr.msk.f32.gmra.mrb[2].mxu0 %vm1184_vm3, %v1163_v49 }
  0xf2   : > { %2818 = vmatprep.mubr.msk.f32.mxu0 %vm1184_vm3, %v1164_v50 }
  0xf4   : > { %3275 = vxpose.xlu1.b32.cont [11/16] (narrow) %v3274_v36, 40 }
  0xf5   : > { %2819 = vmatmul.mubr.msk.f32.gmra.mrb[4].mxu0 %vm1184_vm3, %v1165_v52  ;;  %v3070_v52 = vpack.c.bf16 %v1681_v35, %v1680_v46 }
  0xf6   : > { %2821 = vmatprep.mubr.msk.f32.mxu0 %vm1184_vm3, %v1166_v53 }
  0xf8   : > { %3277 = vxpose.xlu1.b32.cont [12/16] (narrow) %v3276_v39, 40  ;;  %v1682_v39 = vld [vmem:[%s4407_s9 + $0x60] sm:$0xff] }
  0xf9   : > { %2822 = vmatmul.mubr.msk.f32.gmra.mrb[6].mxu0 %vm1184_vm3, %v1167_v54  ;;  %v1683_v54 = vld [vmem:[%s4407_s9 + $0x68] sm:$0xff] }
  0xfa   : > { %2824 = vmatprep.mubr.msk.f32.mxu0 %vm1184_vm3, %v1168_v55 }
  0xfc   : > { %3279 = vxpose.xlu1.b32.cont [13/16] (narrow) %v3278_v40, 40 }
  0xfd   : > { %2825 = vmatmul.mubr.msk.f32.gmra.mrb[8].mxu0 %vm1184_vm3, %v1169_v56 }
  0xfe   : > { %2827 = vmatprep.mubr.msk.f32.mxu0 %vm1184_vm3, %v1170_v57  ;;  %v3074_v57 = vpack.c.bf16 %v1683_v54, %v1682_v39 }
 0x100   : > { %3281 = vxpose.xlu1.b32.cont [14/16] (narrow) %v3280_v43, 40 }
 0x101   : > { %2828 = vmatmul.mubr.msk.f32.gmra.mrb[10].mxu0 %vm1184_vm3, %v1171_v58  ;;  %v1684_v58 = vld [vmem:[%s4407_s9 + $0x70] sm:$0xff] }
 0x102   : > { %2830 = vmatprep.mubr.msk.f32.mxu0 %vm1184_vm3, %v1172_v59  ;;  %v1685_v59 = vld [vmem:[%s4407_s9 + $0x78] sm:$0xff] }
 0x104   : > { %3283 = vxpose.xlu1.b32.cont [15/16] (narrow) %v3282_v60, 40 }
 0x105   : > { %2831 = vmatmul.mubr.msk.f32.gmra.mrb[12].mxu0 %vm1184_vm3, %v1173_v44 }
 0x106   : > { %2833 = vmatprep.mubr.msk.f32.mxu0 %vm1184_vm3, %v1174_v61 }
 0x108   : > { %3285 = vxpose.xlu1.b32.end [16/16] (narrow) %v3284_v62, 40  ;;  %v3078_v62 = vpack.c.bf16 %v1685_v59, %v1684_v58 }
 0x109   : > { %2834 = vmatmul.mubr.msk.f32.gmra.mrb[14].mxu0 %vm1184_vm3, %v1175_v47 }
 0x1c0   : > { %v2814_v9 = vpop.f32.mrb[0].mxu0 }
 0x1c1   : > { %v1299_v11 = vpop.f32.mrb[1].mxu0  ;;  %v3966_v15 = vadd.f32 %v2814_v9, %v3954_v7 }
 0x1c2   : > { %v3963_v14 = vadd.f32 %v3954_v7, %v1299_v11 }
 0x1c3   : > { %v1418_v23 = vmax.f32 %v3966_v15, 0.0 }
 0x1c4   : > { %v1417_v16 = vmax.f32 %v3963_v14, 0.0  ;;  %v2817_v17 = vpop.f32.mrb[2].mxu0 }
 0x1c5   : > { %v1309_v19 = vpop.f32.mrb[3].mxu0  ;;  %v3992_v29 = vadd.f32 %v2817_v17, %v3954_v7 }
 0x1c6   : > { %1542 = vmatmul.mubr.f32.vlgmr.msra.gmra.mrb[0].mxu1 %v1417_v16  ;;  %v3980_v24 = vadd.f32 %v3954_v7, %v1309_v19 }
 0x1c7   : > { %1547 = vmatprep.mubr.f32.mxu1 %v3410_v6  ;;  %3053 = vmatpush3.bf16.msra.mxu1 %v3050_v5  ;;  %v1420_v32 = vmax.f32 %v3992_v29, 0.0 }
 0x1c8   : > { %v2820_v26 = vpop.f32.mrb[4].mxu0  ;;  %3055 = vmatprep.subr.bf16.mxu1 %v3054_v18  ;;  %v1419_v30 = vmax.f32 %v3980_v24, 0.0 }
 0x1c9   : > { %v1319_v22 = vpop.f32.mrb[5].mxu0  ;;  %v4018_v49 = vadd.f32 %v2820_v26, %v3954_v7  ;;  %v1465_v26 = vld [vmem:[%s4406_s8] sm:$0x3] }
 0x1ca   : > { %1548 = vmatmul.mubr.f32.gmra.mrb[2].mxu1 %v1418_v23  ;;  %v4006_v41 = vadd.f32 %v3954_v7, %v1319_v22 }
 0x1cb   : > { %1553 = vmatprep.mubr.f32.mxu1 %v3410_v6  ;;  %3057 = vmatpush3.bf16.msra.mxu1 %v3054_v18  ;;  %v1422_v55 = vmax.f32 %v4018_v49, 0.0 }
 0x1cc   : > { %v2823_v33 = vpop.f32.mrb[6].mxu0  ;;  %3059 = vmatprep.subr.bf16.mxu1 %v3058_v27  ;;  %v1421_v50 = vmax.f32 %v4006_v41, 0.0 }
 0x1cd   : > { %v1329_v34 = vpop.f32.mrb[7].mxu0  ;;  %v1408_v60 = vadd.f32 %v2823_v33, %v3954_v7 }
 0x1ce   : > { %1554 = vmatmul.mubr.f32.gmra.mrb[4].mxu1 %v1419_v30  ;;  %v1407_v40 = vadd.f32 %v3954_v7, %v1329_v34 }
 0x1cf   : > { %1559 = vmatprep.mubr.f32.mxu1 %v3410_v6  ;;  %3061 = vmatpush3.bf16.msra.mxu1 %v3058_v27  ;;  %v1424_v63 = vmax.f32 %v1408_v60, 0.0 }
 0x1d0   : > { %v2826_v42 = vpop.f32.mrb[8].mxu0  ;;  %3063 = vmatprep.subr.bf16.mxu1 %v3062_v31  ;;  %v1423_v44 = vmax.f32 %v1407_v40, 0.0 }
 0x1d1   : > { %v1339_v10 = vpop.f32.mrb[9].mxu0  ;;  %v1410_v0 = vadd.f32 %v2826_v42, %v3954_v7 }
 0x1d2   : > { %1560 = vmatmul.mubr.f32.gmra.mrb[6].mxu1 %v1420_v32  ;;  %v1409_v48 = vadd.f32 %v3954_v7, %v1339_v10 }
 0x1d3   : > { %1565 = vmatprep.mubr.f32.mxu1 %v3410_v6  ;;  %3065 = vmatpush3.bf16.msra.mxu1 %v3062_v31  ;;  %v1426_v51 = vmax.f32 %v1410_v0, 0.0 }
 0x1d4   : > { %v2829_v36 = vpop.f32.mrb[10].mxu0  ;;  %3067 = vmatprep.subr.bf16.mxu1 %v3066_v45  ;;  %v1425_v1 = vmax.f32 %v1409_v48, 0.0 }
 0x1d5   : > { %v1349_v53 = vpop.f32.mrb[11].mxu0  ;;  %v1412_v3 = vadd.f32 %v2829_v36, %v3954_v7 }
 0x1d6   : > { %1566 = vmatmul.mubr.f32.gmra.mrb[8].mxu1 %v1421_v50  ;;  %v1411_v2 = vadd.f32 %v3954_v7, %v1349_v53 }
 0x1d7   : > { %1571 = vmatprep.mubr.f32.mxu1 %v3410_v6  ;;  %3069 = vmatpush3.bf16.msra.mxu1 %v3066_v45  ;;  %v1428_v5 = vmax.f32 %v1412_v3, 0.0 }
 0x1d8   : > { %v2832_v56 = vpop.f32.mrb[12].mxu0  ;;  %3071 = vmatprep.subr.bf16.mxu1 %v3070_v52  ;;  %v1427_v4 = vmax.f32 %v1411_v2, 0.0 }
 0x1d9   : > { %v1359_v43 = vpop.f32.mrb[13].mxu0  ;;  %v1414_v11 = vadd.f32 %v2832_v56, %v3954_v7 }
 0x1da   : > { %1572 = vmatmul.mubr.f32.gmra.mrb[10].mxu1 %v1422_v55  ;;  %v1413_v9 = vadd.f32 %v3954_v7, %v1359_v43 }
 0x1db   : > { %1577 = vmatprep.mubr.f32.mxu1 %v3410_v6  ;;  %3073 = vmatpush3.bf16.msra.mxu1 %v3070_v52  ;;  %v1430_v13 = vmax.f32 %v1414_v11, 0.0 }
 0x1dc   : > { %v2835_v61 = vpop.f32.mrb[14].mxu0  ;;  %3075 = vmatprep.subr.bf16.mxu1 %v3074_v57  ;;  %v1429_v12 = vmax.f32 %v1413_v9, 0.0 }
 0x1dd   : > { %v1369_v47 = vpop.f32.mrb[15].mxu0  ;;  %v1416_v18 = vadd.f32 %v2835_v61, %v3954_v7 }
 0x1de   : > { %1578 = vmatmul.mubr.f32.gmra.mrb[12].mxu1 %v1423_v44  ;;  %v1415_v17 = vadd.f32 %v3954_v7, %v1369_v47 }
 0x1df   : > { %1583 = vmatprep.mubr.f32.mxu1 %v3410_v6  ;;  %3077 = vmatpush3.bf16.msra.mxu1 %v3074_v57  ;;  %v1432_v20 = vmax.f32 %v1416_v18, 0.0 }
 0x1e0   : > { %3079 = vmatprep.subr.bf16.mxu1 %v3078_v62  ;;  %v1431_v19 = vmax.f32 %v1415_v17, 0.0 }
 0x1e2   : > { %1584 = vmatmul.mubr.f32.gmra.mrb[14].mxu1 %v1424_v63 }
 0x1e3   : > { %1589 = vmatprep.mubr.f32.mxu1 %v3410_v6  ;;  %3081 = vmatpush3.bf16.msra.mxu1 %v3078_v62 }
 0x1e6   : > { %1590 = vmatmul.mubr.f32.gmra.mrb[16].mxu1 %v1425_v1 }
 0x1e7   : > { %1595 = vmatprep.mubr.f32.mxu1 %v3410_v6 }
 0x1ea   : > { %1596 = vmatmul.mubr.f32.gmra.mrb[18].mxu1 %v1426_v51 }
 0x1eb   : > { %1601 = vmatprep.mubr.f32.mxu1 %v3410_v6 }
 0x1ee   : > { %1602 = vmatmul.mubr.f32.gmra.mrb[20].mxu1 %v1427_v4 }
 0x1ef   : > { %1607 = vmatprep.mubr.f32.mxu1 %v3410_v6 }
 0x1f2   : > { %1608 = vmatmul.mubr.f32.gmra.mrb[22].mxu1 %v1428_v5 }
 0x1f3   : > { %1613 = vmatprep.mubr.f32.mxu1 %v3410_v6 }
 0x1f6   : > { %1614 = vmatmul.mubr.f32.gmra.mrb[24].mxu1 %v1429_v12 }
 0x1f7   : > { %1619 = vmatprep.mubr.f32.mxu1 %v3410_v6 }
 0x1fa   : > { %1620 = vmatmul.mubr.f32.gmra.mrb[26].mxu1 %v1430_v13 }
 0x1fb   : > { %1625 = vmatprep.mubr.f32.mxu1 %v3410_v6 }
 0x1fe   : > { %1626 = vmatmul.mubr.f32.gmra.mrb[28].mxu1 %v1431_v19 }
 0x1ff   : > { %1631 = vmatprep.mubr.f32.mxu1 %v3410_v6  ;;  %v4067_v6 = vpop.trf.xlu1 }
 0x200   : > { %v3287_v7 = vunpack.i.l.bf16 %v4067_v6 }
 0x202   : > { %1632 = vmatmul.mubr.f32.gmra.mrb[30].mxu1 %v1432_v20  ;;  %2003 = vmatprep.mubr.f32.mxu0 %v3287_v7 }
 0x203   : > { %2868 = vmatprep.mubr.f32.mxu1 %v1417_v16  ;;  %v4070_v14 = vpop.trf.xlu1 }
 0x206   : > { %2869 = vmatmul.mubr.f32.vlgmr.msra.gmra.mrb[32].mxu1 %v1418_v23  ;;  %v1468_v23 = vshrl.u32 %v569_v8, 7 }
 0x207   : > { %2871 = vmatprep.mubr.f32.mxu1 %v1419_v30  ;;  %v4072_v15 = vpop.trf.xlu1 }
 0x208   : > { %v1469_v24 = vsub.s32 0, %v1468_v23  ;;  %v1473_v27 = vsub.s32 1, %v1468_v23 }
 0x20a   : > { %2872 = vmatmul.mubr.f32.gmra.mrb[34].mxu1 %v1420_v32  ;;  %v4082_v22 = vrot.slane %v1465_v26, %v1469_v24  ;;  %v4084_v28 = vrot.slane %v1465_v26, %v1473_v27 }
 0x20b   : > { %2874 = vmatprep.mubr.f32.mxu1 %v1421_v50  ;;  %v4074_v16 = vpop.trf.xlu1 }
 0x20e   : > { %2875 = vmatmul.mubr.f32.gmra.mrb[36].mxu1 %v1422_v55 }
 0x20f   : > { %2877 = vmatprep.mubr.f32.mxu1 %v1423_v44  ;;  %v4076_v21 = vpop.trf.xlu1 }
 0x212   : > { %2878 = vmatmul.mubr.f32.gmra.mrb[38].mxu1 %v1424_v63 }
 0x213   : > { %2880 = vmatprep.mubr.f32.mxu1 %v1425_v1 }
 0x216   : > { %2881 = vmatmul.mubr.f32.gmra.mrb[40].mxu1 %v1426_v51 }
 0x217   : > { %2883 = vmatprep.mubr.f32.mxu1 %v1427_v4 }
 0x21a   : > { %2884 = vmatmul.mubr.f32.gmra.mrb[42].mxu1 %v1428_v5 }
 0x21b   : > { %2886 = vmatprep.mubr.f32.mxu1 %v1429_v12 }
 0x21e   : > { %2887 = vmatmul.mubr.f32.gmra.mrb[44].mxu1 %v1430_v13 }
 0x21f   : > { %2889 = vmatprep.mubr.f32.mxu1 %v1431_v19 }
 0x222   : > { %2890 = vmatmul.mubr.f32.gmra.mrb[46].mxu1 %v1432_v20 }
 0x299   : > { %v1543_v25 = vpop.f32.mrb[0].mxu1 }
 0x29a   : > { %v1545_v29 = vpop.f32.mrb[1].mxu1  ;;  %v1544_v30 = vadd.f32 %v1543_v25, %v4082_v22 }
 0x29b   : > { %v1546_v33 = vadd.f32 %v1545_v29, %v4084_v28 }
 0x29c   : > { %v1638_v38 = vmax.f32 %v1544_v30, 0.0 }
 0x29d   : > { %v1549_v31 = vpop.f32.mrb[2].mxu1  ;;  %v1639_v41 = vmax.f32 %v1546_v33, 0.0 }
 0x29e   : > { %v1550_v34 = vadd.f32 %v1549_v31, %v4082_v22  ;;  %v1551_v8 = vpop.f32.mrb[3].mxu1 }
 0x29f   : > { %v1552_v37 = vadd.f32 %v1551_v8, %v4084_v28 }
 0x2a0   : > { %v1640_v32 = vmax.f32 %v1550_v34, 0.0 }
 0x2a1   : > { %v1641_v42 = vmax.f32 %v1552_v37, 0.0  ;;  %v1555_v45 = vpop.f32.mrb[4].mxu1 }
 0x2a2   : > { %v3084_v10 = vpack.c.bf16 %v1640_v32, %v1638_v38  ;;  %v1557_v46 = vpop.f32.mrb[5].mxu1  ;;  %v1556_v49 = vadd.f32 %v1555_v45, %v4082_v22 }
 0x2a3   : > { %v3082_v35 = vpack.c.bf16 %v1641_v42, %v1639_v41  ;;  %v1558_v50 = vadd.f32 %v1557_v46, %v4084_v28 }
 0x2a4   : > { %v1642_v54 = vmax.f32 %v1556_v49, 0.0 }
 0x2a5   : > { %v1561_v36 = vpop.f32.mrb[6].mxu1  ;;  %3083 = vmatprep.subr.bf16.mxu0 %v3082_v35  ;;  %v1643_v40 = vmax.f32 %v1558_v50, 0.0 }
 0x2a6   : > { %v1562_v52 = vadd.f32 %v1561_v36, %v4082_v22  ;;  %v1563_v53 = vpop.f32.mrb[7].mxu1  ;;  %3085 = vmatpush3.bf16.msra.mxu0 %v3084_v10 }
 0x2a7   : > { %v1564_v39 = vadd.f32 %v1563_v53, %v4084_v28 }
 0x2a8   : > { %v1644_v55 = vmax.f32 %v1562_v52, 0.0 }
 0x2a9   : > { %v1645_v56 = vmax.f32 %v1564_v39, 0.0  ;;  %v1567_v57 = vpop.f32.mrb[8].mxu1 }
 0x2aa   : > { %v3088_v43 = vpack.c.bf16 %v1644_v55, %v1642_v54  ;;  %v1569_v58 = vpop.f32.mrb[9].mxu1  ;;  %v1568_v60 = vadd.f32 %v1567_v57, %v4082_v22 }
 0x2ab   : > { %v3086_v59 = vpack.c.bf16 %v1645_v56, %v1643_v40  ;;  %v1570_v44 = vadd.f32 %v1569_v58, %v4084_v28 }
 0x2ac   : > { %v1646_v48 = vmax.f32 %v1568_v60, 0.0 }
 0x2ad   : > { %v1573_v61 = vpop.f32.mrb[10].mxu1  ;;  %3087 = vmatprep.subr.bf16.mxu0 %v3086_v59  ;;  %v1647_v1 = vmax.f32 %v1570_v44, 0.0 }
 0x2ae   : > { %v1574_v62 = vadd.f32 %v1573_v61, %v4082_v22  ;;  %v1575_v47 = vpop.f32.mrb[11].mxu1  ;;  %3089 = vmatpush3.bf16.msra.mxu0 %v3088_v43 }
 0x2af   : > { %v1576_v63 = vadd.f32 %v1575_v47, %v4084_v28 }
 0x2b0   : > { %v1648_v0 = vmax.f32 %v1574_v62, 0.0 }
 0x2b1   : > { %v1649_v51 = vmax.f32 %v1576_v63, 0.0  ;;  %v1579_v2 = vpop.f32.mrb[12].mxu1 }
 0x2b2   : > { %v3092_v3 = vpack.c.bf16 %v1648_v0, %v1646_v48  ;;  %v1581_v4 = vpop.f32.mrb[13].mxu1  ;;  %v1580_v9 = vadd.f32 %v1579_v2, %v4082_v22 }
 0x2b3   : > { %v3090_v5 = vpack.c.bf16 %v1649_v51, %v1647_v1  ;;  %v1582_v11 = vadd.f32 %v1581_v4, %v4084_v28 }
 0x2b4   : > { %v1650_v19 = vmax.f32 %v1580_v9, 0.0 }
 0x2b5   : > { %v1585_v12 = vpop.f32.mrb[14].mxu1  ;;  %3091 = vmatprep.subr.bf16.mxu0 %v3090_v5  ;;  %v1651_v7 = vmax.f32 %v1582_v11, 0.0 }
 0x2b6   : > { %v1586_v13 = vadd.f32 %v1585_v12, %v4082_v22  ;;  %v1587_v17 = vpop.f32.mrb[15].mxu1  ;;  %3093 = vmatpush3.bf16.msra.mxu0 %v3092_v3 }
 0x2b7   : > { %v1588_v18 = vadd.f32 %v1587_v17, %v4084_v28 }
 0x2b8   : > { %v1652_v20 = vmax.f32 %v1586_v13, 0.0 }
 0x2b9   : > { %v1653_v23 = vmax.f32 %v1588_v18, 0.0  ;;  %v1591_v24 = vpop.f32.mrb[16].mxu1  ;;  %v4121_v18 = vld [vmem:[%s4408_s10] ss:$0 sm:$0xff] }
 0x2ba   : > { %v3096_v26 = vpack.c.bf16 %v1652_v20, %v1650_v19  ;;  %v1593_v27 = vpop.f32.mrb[17].mxu1  ;;  %v1592_v29 = vadd.f32 %v1591_v24, %v4082_v22 }
 0x2bb   : > { %v3094_v25 = vpack.c.bf16 %v1653_v23, %v1651_v7  ;;  %v1594_v30 = vadd.f32 %v1593_v27, %v4084_v28 }
 0x2bc   : > { %v1654_v37 = vmax.f32 %v1592_v29, 0.0 }
 0x2bd   : > { %v1597_v33 = vpop.f32.mrb[18].mxu1  ;;  %3095 = vmatprep.subr.bf16.mxu0 %v3094_v25  ;;  %v1655_v32 = vmax.f32 %v1594_v30, 0.0 }
 0x2be   : > { %v1598_v31 = vadd.f32 %v1597_v33, %v4082_v22  ;;  %v1599_v34 = vpop.f32.mrb[19].mxu1  ;;  %3097 = vmatpush3.bf16.msra.mxu0 %v3096_v26  ;;  %v3290_v33 = vunpack.i.h.bf16 %v4067_v6  ;;  %v3295_v6 = vunpack.i.h.bf16 %v4070_v14 }
 0x2bf   : > { %v1600_v8 = vadd.f32 %v1599_v34, %v4084_v28 }
 0x2c0   : > { %v1656_v38 = vmax.f32 %v1598_v31, 0.0 }
 0x2c1   : > { %v1657_v41 = vmax.f32 %v1600_v8, 0.0  ;;  %v1603_v42 = vpop.f32.mrb[20].mxu1 }
 0x2c2   : > { %v3100_v45 = vpack.c.bf16 %v1656_v38, %v1654_v37  ;;  %v1605_v10 = vpop.f32.mrb[21].mxu1  ;;  %v1604_v35 = vadd.f32 %v1603_v42, %v4082_v22  ;;  %v3292_v37 = vunpack.i.l.bf16 %v4070_v14 }
 0x2c3   : > { %v3098_v46 = vpack.c.bf16 %v1657_v41, %v1655_v32  ;;  %v1606_v49 = vadd.f32 %v1605_v10, %v4084_v28 }
 0x2c4   : > { %v1658_v39 = vmax.f32 %v1604_v35, 0.0 }
 0x2c5   : > { %v1609_v50 = vpop.f32.mrb[22].mxu1  ;;  %3099 = vmatprep.subr.bf16.mxu0 %v3098_v46  ;;  %v1659_v55 = vmax.f32 %v1606_v49, 0.0  ;;  %v3297_v46 = vunpack.i.l.bf16 %v4072_v15 }
 0x2c6   : > { %v1610_v36 = vadd.f32 %v1609_v50, %v4082_v22  ;;  %v1611_v52 = vpop.f32.mrb[23].mxu1  ;;  %3101 = vmatpush3.bf16.msra.mxu0 %v3100_v45 }
 0x2c7   : > { %v1612_v53 = vadd.f32 %v1611_v52, %v4084_v28  ;;  %v3300_v52 = vunpack.i.h.bf16 %v4072_v15 }
 0x2c8   : > { %v1660_v54 = vmax.f32 %v1610_v36, 0.0 }
 0x2c9   : > { %v1661_v40 = vmax.f32 %v1612_v53, 0.0  ;;  %v1615_v56 = vpop.f32.mrb[24].mxu1 }
 0x2ca   : > { %v3104_v57 = vpack.c.bf16 %v1660_v54, %v1658_v39  ;;  %v1617_v43 = vpop.f32.mrb[25].mxu1  ;;  %v1616_v59 = vadd.f32 %v1615_v56, %v4082_v22  ;;  %v3302_v39 = vunpack.i.l.bf16 %v4074_v16 }
 0x2cb   : > { %v3102_v58 = vpack.c.bf16 %v1661_v40, %v1659_v55  ;;  %v1618_v60 = vadd.f32 %v1617_v43, %v4084_v28 }
 0x2cc   : > { %v1662_v63 = vmax.f32 %v1616_v59, 0.0 }
 0x2cd   : > { %v1621_v44 = vpop.f32.mrb[26].mxu1  ;;  %3103 = vmatprep.subr.bf16.mxu0 %v3102_v58  ;;  %v1663_v0 = vmax.f32 %v1618_v60, 0.0  ;;  %v3307_v58 = vunpack.i.l.bf16 %v4076_v21 }
 0x2ce   : > { %v1622_v61 = vadd.f32 %v1621_v44, %v4082_v22  ;;  %v1623_v62 = vpop.f32.mrb[27].mxu1  ;;  %3105 = vmatpush3.bf16.msra.mxu0 %v3104_v57  ;;  %v3305_v57 = vunpack.i.h.bf16 %v4074_v16 }
 0x2cf   : > { %v1624_v47 = vadd.f32 %v1623_v62, %v4084_v28 }
 0x2d0   : > { %v1664_v48 = vmax.f32 %v1622_v61, 0.0  ;;  %v3310_v61 = vunpack.i.h.bf16 %v4076_v21 }
 0x2d1   : > { %v1665_v1 = vmax.f32 %v1624_v47, 0.0  ;;  %v1627_v51 = vpop.f32.mrb[28].mxu1 }
 0x2d2   : > { %v3108_v2 = vpack.c.bf16 %v1664_v48, %v1662_v63  ;;  %v1629_v3 = vpop.f32.mrb[29].mxu1  ;;  %v1628_v5 = vadd.f32 %v1627_v51, %v4082_v22 }
 0x2d3   : > { %v3106_v4 = vpack.c.bf16 %v1665_v1, %v1663_v0  ;;  %v1630_v9 = vadd.f32 %v1629_v3, %v4084_v28 }
 0x2d4   : > { %v1666_v19 = vmax.f32 %v1628_v5, 0.0 }
 0x2d5   : > { %v1633_v11 = vpop.f32.mrb[30].mxu1  ;;  %3107 = vmatprep.subr.bf16.mxu0 %v3106_v4  ;;  %v1667_v7 = vmax.f32 %v1630_v9, 0.0 }
 0x2d6   : > { %v1634_v12 = vadd.f32 %v1633_v11, %v4082_v22  ;;  %v1635_v13 = vpop.f32.mrb[31].mxu1  ;;  %3109 = vmatpush3.bf16.msra.mxu0 %v3108_v2 }
 0x2d7   : > { %v1636_v17 = vadd.f32 %v1635_v13, %v4084_v28 }
 0x2d8   : > { %v1668_v20 = vmax.f32 %v1634_v12, 0.0 }
 0x2d9   : > { %v1669_v23 = vmax.f32 %v1636_v17, 0.0  ;;  %v2870_v24 = vpop.f32.mrb[32].mxu1 }
 0x2da   : > { %v3112_v26 = vpack.c.bf16 %v1668_v20, %v1666_v19  ;;  %v1765_v27 = vadd.f32 %v2870_v24, %v4121_v18  ;;  %v1759_v22 = vpop.f32.mrb[33].mxu1  ;;  %v1870_v20 = vld [vmem:[#allocation2] sm:$0xff] }
 0x2db   : > { %v3110_v25 = vpack.c.bf16 %v1669_v23, %v1667_v7  ;;  %v1760_v29 = vadd.f32 %v4121_v18, %v1759_v22 }
 0x2dc   : > { %v1839_v28 = vmax.f32 %v1765_v27, 0.0  ;;  %v1871_v27 = vld [vmem:[#allocation2 + $0x8] sm:$0xff] }
 0x2dd   : > { %v1838_v30 = vmax.f32 %v1760_v29, 0.0  ;;  %v2873_v31 = vpop.f32.mrb[34].mxu1  ;;  %3111 = vmatprep.subr.bf16.mxu0 %v3110_v25 }
 0x2de   : > { %1855 = vst [vmem:[%s3569_s24 + $0x8] sm:$0xff] %v1839_v28  ;;  %v1775_v34 = vadd.f32 %v2873_v31, %v4121_v18  ;;  %v1769_v8 = vpop.f32.mrb[35].mxu1  ;;  %3113 = vmatpush3.bf16.msra.mxu0 %v3112_v26 }
 0x2df   : > { %1854 = vst [vmem:[%s3569_s24] sm:$0xff] %v1838_v30  ;;  %v1770_v38 = vadd.f32 %v4121_v18, %v1769_v8  ;;  %v1872_v30 = vld [vmem:[#allocation2 + $0x10] sm:$0xff]  ;;  %v1873_v8 = vld [vmem:[#allocation2 + $0x18] sm:$0xff] }
 0x2e0   : > { %v1841_v32 = vmax.f32 %v1775_v34, 0.0 }
 0x2e1   : > { %v1840_v41 = vmax.f32 %v1770_v38, 0.0  ;;  %v2876_v42 = vpop.f32.mrb[36].mxu1  ;;  %2004 = vmatmul.mubr.f32.vlgmr.msra.gmra.mrb[16].mxu0 %v3290_v33 }
 0x2e2   : > { %1857 = vst [vmem:[%s3569_s24 + $0x18] sm:$0xff] %v1841_v32  ;;  %v1785_v45 = vadd.f32 %v2876_v42, %v4121_v18  ;;  %v1779_v10 = vpop.f32.mrb[37].mxu1  ;;  %2008 = vmatprep.mubr.f32.mxu0 %v3292_v37  ;;  %v1874_v42 = vld [vmem:[#allocation2 + $0x20] sm:$0xff] }
 0x2e3   : > { %1856 = vst [vmem:[%s3569_s24 + $0x10] sm:$0xff] %v1840_v41  ;;  %v1780_v35 = vadd.f32 %v4121_v18, %v1779_v10 }
 0x2e4   : > { %v1843_v49 = vmax.f32 %v1785_v45, 0.0 }
 0x2e5   : > { %v1842_v50 = vmax.f32 %v1780_v35, 0.0  ;;  %v2879_v36 = vpop.f32.mrb[38].mxu1  ;;  %2009 = vmatmul.mubr.f32.gmra.mrb[18].mxu0 %v3295_v6  ;;  %v2050_v35 = vld [vmem:[%s4435_s2 + $0x10] sm:$0xff] (!%p2530_p12) }
 0x2e6   : > { %1859 = vst [vmem:[%s3569_s24 + $0x28] sm:$0xff] %v1843_v49  ;;  %v1795_v14 = vadd.f32 %v2879_v36, %v4121_v18  ;;  %v1789_v53 = vpop.f32.mrb[39].mxu1  ;;  %2013 = vmatprep.mubr.f32.mxu0 %v3297_v46  ;;  %v2048_v46 = vld [vmem:[%s4435_s2] sm:$0xff] (!%p2530_p12)  ;;  %v3412_v49 = vmov (!%p2530_p12), 0   ;;  %v2084_v36 = vld [vmem:[%s4409_s11 + $0x8] sm:$0xff] (!%p2530_p12) }
 0x2e7   : > { %1858 = vst [vmem:[%s3569_s24 + $0x20] sm:$0xff] %v1842_v50  ;;  %v1790_v54 = vadd.f32 %v4121_v18, %v1789_v53  ;;  %3312 = vset.pattern.permute.xlu0 (!%p2530_p12), %v3412_v49  ;;  %3313 = vset.pattern.permute.xlu1 (!%p2530_p12), %v3412_v49  ;;  %v2083_v50 = vld [vmem:[%s4409_s11] sm:$0xff] (!%p2530_p12)  ;;  %v2049_v53 = vld [vmem:[%s4435_s2 + $0x8] sm:$0xff] (!%p2530_p12) }
 0x2e8   : > { %v1845_v55 = vmax.f32 %v1795_v14, 0.0  ;;  %2055 = vperm.xlu0 (!%p2530_p12), %3312, %v2048_v46   ;;  %2065 = vperm.xlu1 (!%p2530_p12), %3313, %v2050_v35   ;;  %v2086_v14 = vld [vmem:[%s4409_s11 + $0x18] sm:$0xff] (!%p2530_p12) }
 0x2e9   : > { %v1844_v40 = vmax.f32 %v1790_v54, 0.0  ;;  %v2882_v56 = vpop.f32.mrb[40].mxu1  ;;  %2014 = vmatmul.mubr.f32.gmra.mrb[20].mxu0 %v3300_v52  ;;  %v2085_v52 = vld [vmem:[%s4409_s11 + $0x10] sm:$0xff] (!%p2530_p12)  ;;  %v3413_v54 = vmov (!%p2530_p12), 0.0|0.0  }
 0x2ea   : > { %1861 = vst [vmem:[%s3569_s24 + $0x38] sm:$0xff] %v1845_v55  ;;  %v1805_v15 = vadd.f32 %v2882_v56, %v4121_v18  ;;  %v1799_v43 = vpop.f32.mrb[41].mxu1  ;;  %2018 = vmatprep.mubr.f32.mxu0 %v3302_v39  ;;  %v2051_v39 = vld [vmem:[%s4435_s2 + $0x18] sm:$0xff] (!%p2530_p12)  ;;  %3114 = vmatprep.subr.bf16.mxu0 (!%p2530_p12), %v3413_v54  ;;  %v3115_v55 = vpack.c.bf16 (!%p2530_p12), %v2084_v36, %v2083_v50  ;;  %v2215_v36 = vld [vmem:[%s4411_s13 + $0x70] sm:$0xff] (!%p2530_p12) }
 0x2eb   : > { %1860 = vst [vmem:[%s3569_s24 + $0x30] sm:$0xff] %v1844_v40  ;;  %v1800_v59 = vadd.f32 %v4121_v18, %v1799_v43  ;;  %v3415_v40 = vmov (!%p2530_p12), 0.0   ;;  %3138 = vmatprep.subr.bf16.mxu1 (!%p2530_p12), %v3413_v54  ;;  %v3118_v56 = vpack.c.bf16 (!%p2530_p12), %v2086_v14, %v2085_v52  ;;  %v2052_v43 = vld [vmem:[%s4435_s2 + $0x20] sm:$0xff] (!%p2530_p12)  ;;  %v2216_v52 = vld [vmem:[%s4411_s13 + $0x78] sm:$0xff] (!%p2530_p12) }
 0x2ec   : > { %v1847_v60 = vmax.f32 %v1805_v15, 0.0  ;;  %2971 = vmatprep.mubr.msk.f32.mxu1 (!%p2530_p12), %vm3414_vm0, %v3415_v40  ;;  %3116 = vmatpush3.bf16.msra.mxu0 (!%p2530_p12), %v3115_v55  ;;  %v2088_v15 = vld [vmem:[%s4409_s11 + $0x28] sm:$0xff] (!%p2530_p12)  ;;  %v3160_v14 = vpack.c.bf16 (!%p2530_p12), %v2216_v52, %v2215_v36 }
 0x2ed   : > { %v1846_v44 = vmax.f32 %v1800_v59, 0.0  ;;  %v2885_v62 = vpop.f32.mrb[42].mxu1  ;;  %2019 = vmatmul.mubr.f32.gmra.mrb[22].mxu0 %v3305_v57  ;;  %2060 = vperm.xlu0 (!%p2530_p12), %3312, %v2049_v53   ;;  %v2087_v57 = vld [vmem:[%s4409_s11 + $0x20] sm:$0xff] (!%p2530_p12)  ;;  %v2089_v59 = vld [vmem:[%s4409_s11 + $0x30] sm:$0xff] (!%p2530_p12) }
 0x2ee   : > { %1863 = vst [vmem:[%s3569_s24 + $0x48] sm:$0xff] %v1847_v60  ;;  %v1815_v16 = vadd.f32 %v2885_v62, %v4121_v18  ;;  %v1809_v47 = vpop.f32.mrb[43].mxu1  ;;  %2023 = vmatprep.mubr.f32.mxu0 %v3307_v58  ;;  %2070 = vperm.xlu1 (!%p2530_p12), %3313, %v2051_v39   ;;  %v3121_v58 = vpack.c.bf16 (!%p2530_p12), %v2088_v15, %v2087_v57  ;;  %v2090_v60 = vld [vmem:[%s4409_s11 + $0x38] sm:$0xff] (!%p2530_p12)  ;;  %v2092_v62 = vld [vmem:[%s4409_s11 + $0x48] sm:$0xff] (!%p2530_p12)  ;;  %v2531_v53 = vld [vmem:[%s4410_s12] ss:$0 sm:$0xff] (!%p2530_p12) }
 0x2ef   : > { %1862 = vst [vmem:[%s3569_s24 + $0x40] sm:$0xff] %v1846_v44  ;;  %v1810_v63 = vadd.f32 %v4121_v18, %v1809_v47  ;;  %3117 = vmatprep.subr.bf16.mxu0 (!%p2530_p12), %v3413_v54  ;;  %v3124_v44 = vpack.c.bf16 (!%p2530_p12), %v2090_v60, %v2089_v59  ;;  %v2093_v47 = vld [vmem:[%s4409_s11 + $0x50] sm:$0xff] (!%p2530_p12) }
 0x2f0   : > { %v1849_v48 = vmax.f32 %v1815_v16, 0.0  ;;  %3119 = vmatpush3.bf16.msra.mxu0 (!%p2530_p12), %v3118_v56 }
 0x2f1   : > { %v1848_v0 = vmax.f32 %v1810_v63, 0.0  ;;  %v2888_v1 = vpop.f32.mrb[44].mxu1  ;;  %2024 = vmatmul.mubr.f32.gmra.mrb[24].mxu0 %v3310_v61  ;;  %2075 = vperm.xlu0 (!%p2530_p12), %3312, %v2052_v43   ;;  %v2091_v61 = vld [vmem:[%s4409_s11 + $0x40] sm:$0xff] (!%p2530_p12)  ;;  %v2094_v63 = vld [vmem:[%s4409_s11 + $0x58] sm:$0xff] (!%p2530_p12) }
 0x2f2   : > { %1865 = vst [vmem:[%s3569_s24 + $0x58] sm:$0xff] %v1849_v48  ;;  %v1825_v21 = vadd.f32 %v2888_v1, %v4121_v18  ;;  %v1819_v51 = vpop.f32.mrb[45].mxu1  ;;  %2924 = vmatprep.mubr.msk.f32.mxu0 (!%p2530_p12), %vm3414_vm0, %v3415_v40  ;;  %3120 = vmatprep.subr.bf16.mxu0 (!%p2530_p12), %v3413_v54  ;;  %v3127_v16 = vpack.c.bf16 (!%p2530_p12), %v2092_v62, %v2091_v61  ;;  %v2201_v48 = vld [vmem:[%s4411_s13] sm:$0xff] (!%p2530_p12)  ;;  %v2203_v1 = vld [vmem:[%s4411_s13 + $0x10] sm:$0xff] (!%p2530_p12) }
 0x2f3   : > { %1864 = vst [vmem:[%s3569_s24 + $0x50] sm:$0xff] %v1848_v0  ;;  %v1820_v2 = vadd.f32 %v4121_v18, %v1819_v51  ;;  %v2202_v0 = vld [vmem:[%s4411_s13 + $0x8] sm:$0xff] (!%p2530_p12) }
 0x2f4   : > { %v1851_v3 = vmax.f32 %v1825_v21, 0.0  ;;  %3122 = vmatpush3.bf16.msra.mxu0 (!%p2530_p12), %v3121_v58  ;;  %v3130_v21 = vpack.c.bf16 (!%p2530_p12), %v2094_v63, %v2093_v47  ;;  %v3139_v51 = vpack.c.bf16 (!%p2530_p12), %v2202_v0, %v2201_v48 }
 0x2f5   : > { %v1850_v4 = vmax.f32 %v1820_v2, 0.0  ;;  %v2891_v5 = vpop.f32.mrb[46].mxu1  ;;  %3123 = vmatprep.subr.bf16.mxu0 (!%p2530_p12), %v3413_v54  ;;  %v2204_v2 = vld [vmem:[%s4411_s13 + $0x18] sm:$0xff] (!%p2530_p12) }
 0x2f6   : > { %1867 = vst [vmem:[%s3569_s24 + $0x68] sm:$0xff] %v1851_v3  ;;  %v1835_v9 = vadd.f32 %v2891_v5, %v4121_v18  ;;  %v1829_v11 = vpop.f32.mrb[47].mxu1  ;;  %v2095_v3 = vld [vmem:[%s4409_s11 + $0x60] sm:$0xff] (!%p2530_p12)  ;;  %3140 = vmatpush3.bf16.msra.mxu1 (!%p2530_p12), %v3139_v51  ;;  %v3142_v5 = vpack.c.bf16 (!%p2530_p12), %v2204_v2, %v2203_v1 }
 0x2f7   : > { %1866 = vst [vmem:[%s3569_s24 + $0x60] sm:$0xff] %v1850_v4  ;;  %v1830_v12 = vadd.f32 %v4121_v18, %v1829_v11  ;;  %v2096_v4 = vld [vmem:[%s4409_s11 + $0x68] sm:$0xff] (!%p2530_p12)  ;;  %3141 = vmatprep.subr.bf16.mxu1 (!%p2530_p12), %v3413_v54  ;;  %v2532_v51 = vld [vmem:[%s4412_s14] ss:$0 sm:$0xff] (!%p2530_p12) }
 0x2f8   : > { %v1853_v13 = vmax.f32 %v1835_v9, 0.0  ;;  %3125 = vmatpush3.bf16.msra.mxu0 (!%p2530_p12), %v3124_v44  ;;  %v2205_v9 = vld [vmem:[%s4411_s13 + $0x20] sm:$0xff] (!%p2530_p12)  ;;  %v2206_v11 = vld [vmem:[%s4411_s13 + $0x28] sm:$0xff] (!%p2530_p12) }
 0x2f9   : > { %v1852_v17 = vmax.f32 %v1830_v12, 0.0  ;;  %3126 = vmatprep.subr.bf16.mxu0 (!%p2530_p12), %v3413_v54  ;;  %v3133_v12 = vpack.c.bf16 (!%p2530_p12), %v2096_v4, %v2095_v3 }
 0x2fa   : > { %1869 = vst [vmem:[%s3569_s24 + $0x78] sm:$0xff] %v1853_v13  ;;  %v2097_v13 = vld [vmem:[%s4409_s11 + $0x70] sm:$0xff] (!%p2530_p12)  ;;  %3143 = vmatpush3.bf16.msra.mxu1 (!%p2530_p12), %v3142_v5 }
 0x2fb   : > { %1868 = vst [vmem:[%s3569_s24 + $0x70] sm:$0xff] %v1852_v17  ;;  %v2098_v17 = vld [vmem:[%s4409_s11 + $0x78] sm:$0xff] (!%p2530_p12)  ;;  %3144 = vmatprep.subr.bf16.mxu1 (!%p2530_p12), %v3413_v54 }
 0x2fc   : > { %3128 = vmatpush3.bf16.msra.mxu0 (!%p2530_p12), %v3127_v16 }
 0x2fd   : > { %3129 = vmatprep.subr.bf16.mxu0 (!%p2530_p12), %v3413_v54 }
 0x300   : > { %3131 = vmatpush3.bf16.msra.mxu0 (!%p2530_p12), %v3130_v21 }
 0x301   : > { %3132 = vmatprep.subr.bf16.mxu0 (!%p2530_p12), %v3413_v54 }
 0x304   : > { %3134 = vmatpush3.bf16.msra.mxu0 (!%p2530_p12), %v3133_v12 }
 0x305   : > { %3135 = vmatprep.subr.bf16.mxu0 (!%p2530_p12), %v3413_v54 }
 0x3b4   : > { %v2671_v19 = vpop.f32.mrb[16].mxu0 }
 0x3b5   : > { %v2672_v7 = vpop.f32.mrb[17].mxu0 }
 0x3b6   : > { %v2673_v23 = vadd.f32 %v2672_v7, %v2671_v19  ;;  %v3145_v19 = vpack.c.bf16 (!%p2530_p12), %v2206_v11, %v2205_v9  ;;  %v2208_v7 = vld [vmem:[%s4411_s13 + $0x38] sm:$0xff] (!%p2530_p12) }
 0x3b8   : > { %v2029_v24 = vadd.f32 %v2673_v23, %v1870_v20  ;;  %v2674_v26 = vpop.f32.mrb[18].mxu0  ;;  %v2207_v20 = vld [vmem:[%s4411_s13 + $0x30] sm:$0xff] (!%p2530_p12)  ;;  %v3136_v23 = vpack.c.bf16 (!%p2530_p12), %v2098_v17, %v2097_v13  ;;  %3146 = vmatpush3.bf16.msra.mxu1 (!%p2530_p12), %v3145_v19 }
 0x3b9   : > { %v2675_v22 = vpop.f32.mrb[19].mxu0  ;;  %3147 = vmatprep.subr.bf16.mxu1 (!%p2530_p12), %v3413_v54 }
 0x3ba   : > { %2034 = vst [vmem:[#allocation2] sm:$0xff] %v2029_v24  ;;  %v2676_v25 = vadd.f32 %v2675_v22, %v2674_v26  ;;  %v3148_v24 = vpack.c.bf16 (!%p2530_p12), %v2208_v7, %v2207_v20  ;;  %v2209_v26 = vld [vmem:[%s4411_s13 + $0x40] sm:$0xff] (!%p2530_p12)  ;;  %3137 = vmatpush3.bf16.msra.mxu0 (!%p2530_p12), %v3136_v23 }
 0x3bc   : > { %v2030_v29 = vadd.f32 %v2676_v25, %v1871_v27  ;;  %v2677_v28 = vpop.f32.mrb[20].mxu0  ;;  %v2210_v27 = vld [vmem:[%s4411_s13 + $0x48] sm:$0xff] (!%p2530_p12)  ;;  %3149 = vmatpush3.bf16.msra.mxu1 (!%p2530_p12), %v3148_v24  ;;  %v2211_v25 = vld [vmem:[%s4411_s13 + $0x50] sm:$0xff] (!%p2530_p12) }
 0x3bd   : > { %v2678_v33 = vpop.f32.mrb[21].mxu0  ;;  %v3151_v22 = vpack.c.bf16 (!%p2530_p12), %v2210_v27, %v2209_v26  ;;  %3150 = vmatprep.subr.bf16.mxu1 (!%p2530_p12), %v3413_v54 }
 0x3be   : > { %2035 = vst [vmem:[#allocation2 + $0x8] sm:$0xff] %v2030_v29  ;;  %v2679_v18 = vadd.f32 %v2678_v33, %v2677_v28  ;;  %v2212_v29 = vld [vmem:[%s4411_s13 + $0x58] sm:$0xff] (!%p2530_p12)  ;;  %v2214_v33 = vld [vmem:[%s4411_s13 + $0x68] sm:$0xff] (!%p2530_p12) }
 0x3bf   : > { %v3154_v28 = vpack.c.bf16 (!%p2530_p12), %v2212_v29, %v2211_v25 }
 0x3c0   : > { %v2031_v31 = vadd.f32 %v2679_v18, %v1872_v30  ;;  %v2680_v34 = vpop.f32.mrb[22].mxu0  ;;  %3152 = vmatpush3.bf16.msra.mxu1 (!%p2530_p12), %v3151_v22  ;;  %v2213_v30 = vld [vmem:[%s4411_s13 + $0x60] sm:$0xff] (!%p2530_p12) }
 0x3c1   : > { %v2681_v37 = vpop.f32.mrb[23].mxu0  ;;  %3153 = vmatprep.subr.bf16.mxu1 (!%p2530_p12), %v3413_v54  ;;  %v3157_v18 = vpack.c.bf16 (!%p2530_p12), %v2214_v33, %v2213_v30 }
 0x3c2   : > { %2036 = vst [vmem:[#allocation2 + $0x10] sm:$0xff] %v2031_v31  ;;  %v2682_v38 = vadd.f32 %v2681_v37, %v2680_v34  ;;  %v2043_v31 = vld [vmem:[#allocation2] sm:$0xff] (!%p2530_p12)  ;;  %v2056_v34 = vpop.permute.xlu0 (!%p2530_p12), %2055 }
 0x3c4   : > { %v2032_v32 = vadd.f32 %v2682_v38, %v1873_v8  ;;  %v2683_v41 = vpop.f32.mrb[24].mxu0  ;;  %2042 = sbr.rel (%p2530_p12) target bundleno = 1415 (0x587), region = 88  ;;  %3155 = vmatpush3.bf16.msra.mxu1 (!%p2530_p12), %v3154_v28  ;;  %v2078_v8 = vmul.f32 (!%p2530_p12), %v2056_v34, %v2043_v31  ;;  %v2066_v38 = vpop.permute.xlu1 (!%p2530_p12), %2065 }
 0x3c5   : > { %v2684_v6 = vpop.f32.mrb[25].mxu0  ;;  %3156 = vmatprep.subr.bf16.mxu1 (!%p2530_p12), %v3413_v54  ;;  %v2044_v37 = vld [vmem:[#allocation2 + $0x8] sm:$0xff] (!%p2530_p12) }
 0x3c6   : > { %2037 = vst [vmem:[#allocation2 + $0x18] sm:$0xff] %v2032_v32  ;;  %v2685_v45 = vadd.f32 %v2684_v6, %v2683_v41  ;;  %2925 = vmatmul.mubr.f32.vlgmr.msra.gmra.mrb[0].mxu0 (!%p2530_p12), %v2078_v8  ;;  %v2061_v41 = vpop.permute.xlu0 (!%p2530_p12), %2060 }
 0x3c7   : > { %2927 = vmatprep.mubr.msk.f32.mxu0 (!%p2530_p12), %vm3414_vm0, %v3415_v40 }
 0x3c8   : > { %v2033_v10 = vadd.f32 %v2685_v45, %v1874_v42  ;;  %3158 = vmatpush3.bf16.msra.mxu1 (!%p2530_p12), %v3157_v18  ;;  %v2079_v42 = vmul.f32 (!%p2530_p12), %v2061_v41, %v2044_v37  ;;  %v2071_v45 = vpop.permute.xlu1 (!%p2530_p12), %2070 }
 0x3c9   : > { %3159 = vmatprep.subr.bf16.mxu1 (!%p2530_p12), %v3413_v54  ;;  %v2045_v32 = vld [vmem:[#allocation2 + $0x10] sm:$0xff] (!%p2530_p12) }
 0x3ca   : > { %2038 = vst [vmem:[#allocation2 + $0x20] sm:$0xff] %v2033_v10  ;;  %v2080_v6 = vmul.f32 (!%p2530_p12), %v2066_v38, %v2045_v32  ;;  %2928 = vmatmul.mubr.f32.gmra.mrb[2].mxu0 (!%p2530_p12), %v2079_v42  ;;  %v2076_v35 = vpop.permute.xlu0 (!%p2530_p12), %2075 }
 0x3cb   : > { %2930 = vmatprep.mubr.msk.f32.mxu0 %vm3414_vm0, %v3415_v40 }
 0x3cc   : > { %3161 = vmatpush3.bf16.msra.mxu1 %v3160_v14 }
 0x3cd   : > { %v2046_v10 = vld [vmem:[#allocation2 + $0x18] sm:$0xff] }
 0x3ce   : > { %2931 = vmatmul.mubr.f32.gmra.mrb[4].mxu0 %v2080_v6  ;;  %v2081_v46 = vmul.f32 %v2071_v45, %v2046_v10 }
 0x3cf   : > { %2933 = vmatprep.mubr.msk.f32.mxu0 %vm3414_vm0, %v3415_v40 }
 0x3d1   : > { %v2047_v49 = vld [vmem:[#allocation2 + $0x20] sm:$0xff] }
 0x3d2   : > { %2934 = vmatmul.mubr.f32.gmra.mrb[6].mxu0 %v2081_v46  ;;  %v2082_v50 = vmul.f32 %v2076_v35, %v2047_v49 }
 0x3d3   : > { %2936 = vmatprep.mubr.msk.f32.mxu0 %vm3414_vm0, %v3415_v40 }
 0x3d6   : > { %2937 = vmatmul.mubr.f32.gmra.mrb[8].mxu0 %v2082_v50 }
 0x499   : > { %v2172_v39 = vpop.f32.mrb[0].mxu0 }
 0x49a   : > { %v2173_v54 = vadd.f32 %v2531_v53, %v2172_v39  ;;  %v2926_v55 = vpop.f32.mrb[1].mxu0 }
 0x49c   : > { %v2196_v56 = vmax.f32 %v2173_v54, 0.0 }
 0x49d   : > { %v2177_v57 = vpop.f32.mrb[2].mxu0 }
 0x49e   : > { %v2178_v15 = vadd.f32 %v2531_v53, %v2177_v57  ;;  %v2929_v43 = vpop.f32.mrb[3].mxu0  ;;  %2972 = vmatmul.mubr.f32.vlgmr.msra.gmra.mrb[0].mxu1 %v2196_v56 }
 0x49f   : > { %2974 = vmatprep.mubr.msk.f32.mxu1 %vm3414_vm0, %v3415_v40 }
 0x4a0   : > { %v2197_v58 = vmax.f32 %v2178_v15, 0.0 }
 0x4a1   : > { %v2182_v59 = vpop.f32.mrb[4].mxu0 }
 0x4a2   : > { %v2183_v60 = vadd.f32 %v2531_v53, %v2182_v59  ;;  %v2932_v44 = vpop.f32.mrb[5].mxu0  ;;  %2975 = vmatmul.mubr.f32.gmra.mrb[2].mxu1 %v2197_v58 }
 0x4a3   : > { %2977 = vmatprep.mubr.msk.f32.mxu1 %vm3414_vm0, %v3415_v40 }
 0x4a4   : > { %v2198_v61 = vmax.f32 %v2183_v60, 0.0 }
 0x4a5   : > { %v2187_v62 = vpop.f32.mrb[6].mxu0 }
 0x4a6   : > { %v2188_v16 = vadd.f32 %v2531_v53, %v2187_v62  ;;  %v2935_v47 = vpop.f32.mrb[7].mxu0  ;;  %2978 = vmatmul.mubr.f32.gmra.mrb[4].mxu1 %v2198_v61 }
 0x4a7   : > { %2980 = vmatprep.mubr.msk.f32.mxu1 %vm3414_vm0, %v3415_v40 }
 0x4a8   : > { %v2199_v63 = vmax.f32 %v2188_v16, 0.0 }
 0x4a9   : > { %v2192_v48 = vpop.f32.mrb[8].mxu0 }
 0x4aa   : > { %v2193_v0 = vadd.f32 %v2531_v53, %v2192_v48  ;;  %v2938_v1 = vpop.f32.mrb[9].mxu0  ;;  %2981 = vmatmul.mubr.f32.gmra.mrb[6].mxu1 %v2199_v63 }
 0x4ab   : > { %2983 = vmatprep.mubr.msk.f32.mxu1 %vm3414_vm0, %v3415_v40 }
 0x4ac   : > { %v2200_v21 = vmax.f32 %v2193_v0, 0.0 }
 0x4ae   : > { %2984 = vmatmul.mubr.f32.gmra.mrb[8].mxu1 %v2200_v21 }
 0x571   : > { %v2290_v2 = vpop.f32.mrb[0].mxu1 }
 0x572   : > { %v2291_v3 = vadd.f32 %v2532_v51, %v2290_v2  ;;  %v2973_v4 = vpop.f32.mrb[1].mxu1 }
 0x574   : > { %v2314_v5 = vmax.f32 %v2291_v3, 0.0 }
 0x575   : > { %v2295_v9 = vpop.f32.mrb[2].mxu1 }
 0x576   : > { %2319 = vst [vmem:[#allocation3] sm:$0xff] %v2314_v5  ;;  %v2296_v11 = vadd.f32 %v2532_v51, %v2295_v9  ;;  %v2976_v12 = vpop.f32.mrb[3].mxu1 }
 0x578   : > { %v2315_v13 = vmax.f32 %v2296_v11, 0.0 }
 0x579   : > { %v2300_v17 = vpop.f32.mrb[4].mxu1 }
 0x57a   : > { %2320 = vst [vmem:[#allocation3 + $0x8] sm:$0xff] %v2315_v13  ;;  %v2301_v19 = vadd.f32 %v2532_v51, %v2300_v17  ;;  %v2979_v20 = vpop.f32.mrb[5].mxu1 }
 0x57c   : > { %v2316_v40 = vmax.f32 %v2301_v19, 0.0 }
 0x57d   : > { %v2305_v7 = vpop.f32.mrb[6].mxu1 }
 0x57e   : > { %2321 = vst [vmem:[#allocation3 + $0x10] sm:$0xff] %v2316_v40  ;;  %v2306_v23 = vadd.f32 %v2532_v51, %v2305_v7  ;;  %v2982_v24 = vpop.f32.mrb[7].mxu1 }
 0x580   : > { %v2317_v26 = vmax.f32 %v2306_v23, 0.0 }
 0x581   : > { %v2310_v27 = vpop.f32.mrb[8].mxu1 }
 0x582   : > { %2322 = vst [vmem:[#allocation3 + $0x18] sm:$0xff] %v2317_v26  ;;  %v2311_v22 = vadd.f32 %v2532_v51, %v2310_v27  ;;  %v2985_v25 = vpop.f32.mrb[9].mxu1 }
 0x584   : > { %v2318_v29 = vmax.f32 %v2311_v22, 0.0 }
 0x586   : > { %2323 = vst [vmem:[#allocation3 + $0x20] sm:$0xff] %v2318_v29 }
 0x587 PF: > { %s3416_s17 = smov [#allocation3]  }
 0x588   : > { %s2335_s19 = sshll.u32 %s3416_s17, 4  ;;  %s2336_s19 = int_to_ptr.vmem [resolvable:$true] %s2335_s19 }
 0x589   : > { %s3314_s18 = scalar_lea.vmem %s2336_s19, 640  ;;  %p3321_p3 = scmp.lt.s32.totalorder %s2336_s19, %s2336_s19 }
 0x58a   : > { %p3315_p13 = scmp.ne.s32.totalorder %s2336_s19, %s3314_s18  ;;  %p3322_p4 = scmp.lt.s32.totalorder %s3314_s18, %s3314_s18 }
 0x58c   : > { %p3316_p0 = pnand %p3315_p13, %p395_p2  ;;  %p3323_p7 = por %p3322_p4, %p3321_p3 }
 0x58e   : > { %p3317_p1 = pneg %p3316_p0 }
 0x590   : > { %p3324_p8 = pnand %p3323_p7, %p3317_p1 }
 0x592   : > { %3327 = shalt.err (!%p3324_p8)
}
 0x593   : > { %s3328_s1 = scalar_lea.hbm %s4413_s15, 640 }
 0x594   : > { %p3329_p9 = scmp.ne.s32.totalorder %s4413_s15, %s3328_s1  ;;  %p3334_p12 = scmp.lt.u32.totalorder %s3328_s1, %s4413_s15 }
 0x596   : > { %p3330_p10 = pnand %p3329_p9, %p395_p2 }
 0x598   : > { %p3331_p11 = pneg %p3330_p10 }
 0x59a   : > { %p3336_p13 = pnand %p3334_p12, %p3331_p11 }
 0x59c   : > { %3339 = shalt.err (!%p3336_p13)
}
 0x59d   : > { %s3417_s27 = smov 128   ;;  %s3418_s30 = smov 8  }
 0x59e   : > { %3195 = dma.vmem_to_hbm [thread:$0]  (%p395_p2), %s2336_s19, 640, %s4413_s15, [#allocation4], %s3417_s27, %s3417_s27, %s3418_s30  }
 0x59f   : > { %s2540_s20 = sshll.u32 %s3526_s25, 11  ;;  %s2351_s21 = sshll.u32 %s3569_s24, 4  ;;  %s4346_s21 = int_to_ptr.vmem [resolvable:$true] %s2351_s21 }
 0x5a0   : > { %s4344_s23 = scalar_lea.hbm %s4414_s16, %s2540_s20  ;;  %s4436_s28 = sand.u32 1, %s3398_s22  }
 0x5a1   : > { %s4350_s29 = scalar_lea.sflag [#allocation6], %s4436_s28  ;;  %s3340_s2 = scalar_lea.vmem %s4346_s21, 2048 }
 0x5a2   : > { %p3341_p0 = scmp.ne.s32.totalorder %s4346_s21, %s3340_s2  ;;  %s3419_s19 = smov [#allocation5]  }
 0x5a3   : > { %s3344_s24 = sshll.u32 %s3419_s19, 4  ;;  %s3345_s24 = int_to_ptr.vmem [resolvable:$false] %s3344_s24 }
 0x5a4   : > { %p3342_p1 = pnand %p3341_p0, %p3545_p5  ;;  %s3346_s17 = scalar_lea.vmem %s3345_s24, 4096 }
 0x5a5   : > { %p3347_p4 = scmp.lt.s32.totalorder %s4346_s21, %s3345_s24  ;;  %p3348_p7 = scmp.lt.s32.totalorder %s3346_s17, %s3340_s2 }
 0x5a6   : > { %p3343_p3 = pneg %p3342_p1 }
 0x5a7   : > { %p3349_p8 = por %p3348_p7, %p3347_p4 }
 0x5a9   : > { %p3350_p9 = pnand %p3349_p8, %p3343_p3 }
 0x5ab   : > { %3353 = shalt.err (!%p3350_p9)
}
 0x5ac   : > { %s3354_s18 = scalar_lea.hbm %s4344_s23, 2048  ;;  %s3358_s26 = scalar_lea.hbm %s4414_s16, 6144 }
 0x5ad   : > { %p3355_p10 = scmp.ne.s32.totalorder %s4344_s23, %s3354_s18  ;;  %p3359_p13 = scmp.lt.u32.totalorder %s4344_s23, %s4414_s16 }
 0x5ae   : > { %p3360_p0 = scmp.lt.u32.totalorder %s3358_s26, %s3354_s18  ;;  %p3362_p3 = scmp.lt.u32.totalorder %s3354_s18, %s4344_s23 }
 0x5af   : > { %p3356_p11 = pnand %p3355_p10, %p3545_p5 }
 0x5b0   : > { %p3361_p1 = por %p3360_p0, %p3359_p13 }
 0x5b1   : > { %p3357_p12 = pneg %p3356_p11 }
 0x5b2   : > { %p3363_p4 = por %p3362_p3, %p3361_p1 }
 0x5b4   : > { %p3364_p7 = pnand %p3363_p4, %p3357_p12 }
 0x5b6   : > { %3367 = shalt.err (!%p3364_p7)
}
 0x5b7   : > { %3196 = dma.vmem_to_hbm [thread:$0]  (%p3545_p5), %s4346_s21, 2048, %s4344_s23, %s4350_s29, %s3417_s27, %s3417_s27, %s3418_s30  }
 0x5b8   : > { %3385 = dma.done.wait (%p395_p2), [#allocation4], 640  }
 0x5b9   : > { %3387 = vsyncadd (%p395_p2), [#allocation4], 4294966656 }
 0x5ba PF: > { %s4437_s2 = sld [smem:[#allocation11_spill]]  ;;  %s4438_s24 = sld [smem:[#allocation9_spill]] }
 0x5c0   : > { %p3206_p8 = scmp.ge.s32.totalorder %s4437_s2, 2  ;;  %s2370_s18 = sand.u32 1, %s4438_s24  }
 0x5c1   : > { %s2371_s0 = scalar_lea.sflag [#allocation6], %s2370_s18 }
 0x5c2   : > { %p3201_p9 = pnand %p3206_p8, %p3549_p6 }
 0x5c4   : > { %3389 = dma.done.wait (!%p3201_p9), %s2371_s0, 2048  }
 0x5c5   : > { %3391 = vsyncadd (!%p3201_p9), %s2371_s0, 4294965248  ;;  %s4440_s24 = sld [smem:[#allocation12_spill]]  ;;  %s4441_s20 = sld [smem:[#allocation10_spill]] }
 0x5c6   : > { %s4442_s23 = sld [smem:[#allocation13_spill]]  ;;  %s4443_s21 = smov %s3398_s22 }
 0x5cb   : > { %p28_p5 = scmp.ge.s32.totalorder %s4440_s24, 5   ;;  %s4444_s22 = smov %s4441_s20 }
 0x5cd   :  { %30 = sbr.rel (!%p28_p5) target bundleno = 8 (0x8), region = 135 }
 0x5d4   :  { %2376 = vsyncpa [#allocation4], 1 }
 0x5d5   :  { %2378 = vsyncpa [#allocation4 + $0x1], 1 }
 0x5d6   :  { %2379 = vsyncpa [#allocation6], 1 }
 0x5d7   :  { %2381 = vsyncpa [#allocation6 + $0x1], 1 }

</bundles_post_ra>
